<compile_context>
chip_gen: v7x
topology: tpu7x:2x2x1
jax: 0.10.0
libtpu: 0.0.40
codegen_flags: <defaults>
</compile_context>

<pallas_src>
import functools

import jax
import jax.numpy as jnp
from jax.experimental import pallas as pl
from jax.experimental.pallas import tpu as pltpu

IN_DIM = 100
IN_PAD = 128          # latent dim padded to MXU-aligned K
H1 = 128
H2 = 256
OUT_DIM = 64 * 64     # 4096


def _round_up(n, m):
    return ((n + m - 1) // m) * m


def _bf16_epilogue_default():
    # v5e has no bf16 VPU/EUP path -> keep the tanh epilogue in f32 there.
    try:
        kind = jax.devices()[0].device_kind.lower()
        return "v5" not in kind
    except Exception:
        return False


def _generator_kernel(x_ref, w1_ref, b1_ref, w2_ref, b2_ref, w3_ref, b3_ref,
                      o_ref, *, bf16_epilogue):
    # Layer 1: Linear(100->128) + ReLU (K zero-padded to 128; bf16 operands, f32 acc)
    h1 = jnp.dot(x_ref[...], w1_ref[...], preferred_element_type=jnp.float32)
    h1 = jnp.maximum(h1 + b1_ref[...], 0.0)
    # Layer 2: Linear(128->256) + ReLU
    h2 = jnp.dot(h1.astype(jnp.bfloat16), w2_ref[...], preferred_element_type=jnp.float32)
    h2 = jnp.maximum(h2 + b2_ref[...], 0.0)
    # Layer 3 (one N tile): Linear(256->tn) + Tanh, then the outer forward() ReLU.
    h3 = jnp.dot(h2.astype(jnp.bfloat16), w3_ref[...], preferred_element_type=jnp.float32)
    h3 = h3 + b3_ref[...]
    if bf16_epilogue:
        h3 = h3.astype(jnp.bfloat16)   # bf16 tanh path on v6e/v7x EUP
    h3 = jnp.tanh(h3)
    o_ref[...] = jnp.maximum(h3, 0.0).astype(o_ref.dtype)


def generator_forward(x, params, *, tb=1024, tn=2048,
                      out_dtype=jnp.bfloat16, bf16_epilogue=None):
    """x: [B, 100] float32 -> [B, 4096] `out_dtype` (default bf16)."""
    w1, b1, w2, b2, w3, b3 = params
    B = x.shape[0]
    out_dtype = jnp.dtype(out_dtype)
    if bf16_epilogue is None:
        bf16_epilogue = _bf16_epilogue_default()

    # f32 output doubles writeback and out-tile VMEM: cap the batch tile so
    # the double-buffered out tiles stay within v7x's 64 MiB VMEM.
    if out_dtype.itemsize >= 4:
        tb = min(tb, 512)

    align = 16 if out_dtype.itemsize == 2 else 8   # bf16 sublane packing

    # ---- batch tile selection: bound padding waste instead of always
    #      rounding B up to a big fixed tile ----
    if B <= tb:
        tb_eff = max(align, _round_up(B, align))   # single batch tile
    else:
        tb_eff = 128
        for cand in (1024, 512, 256, 128):
            if cand > tb:
                continue
            pad = _round_up(B, cand)
            if (pad - B) / pad <= 0.125:
                tb_eff = cand
                break
    b_pad = _round_up(B, tb_eff)

    tn = min(tn, OUT_DIM)
    assert OUT_DIM % tn == 0 and tn % 128 == 0
    n_tiles = OUT_DIM // tn
    b_tiles = b_pad // tb_eff

    # ---- one-time wrapper-side layout prep (outside the kernel) ----
    x_p = jnp.zeros((b_pad, IN_PAD), jnp.bfloat16)
    x_p = x_p.at[:B, :IN_DIM].set(x.astype(jnp.bfloat16))
    w1_p = jnp.zeros((IN_PAD, H1), jnp.bfloat16).at[:IN_DIM, :].set(w1.astype(jnp.bfloat16))
    w2_b = w2.astype(jnp.bfloat16)
    w3_b = w3.astype(jnp.bfloat16)

    def resident(a):
        # full-array block, constant index: DMA'd once, stays in VMEM
        zeros = (0,) * a.ndim
        return pl.BlockSpec(a.shape, lambda j, i: zeros)

    # VMEM sized from the actual live buffers (headroom-capped for v7x 64 MiB).
    tile_bytes = (
        2 * tb_eff * IN_PAD * 2                          # x tile, double-buffered (bf16)
        + 2 * tb_eff * tn * out_dtype.itemsize           # out tile, double-buffered
        + 2 * (H2 * tn * 2 + tn * 4)                     # w3/b3 N-slices, double-buffered
        + (IN_PAD * H1 + H1 * H2) * 2 + (H1 + H2) * 4    # resident weights/biases
        + tb_eff * (H1 + H2 + tn) * 4                    # f32 intermediates
        + tb_eff * (H1 + H2 + tn) * 2                    # bf16 temporaries
    )
    vmem_bytes = max(32 << 20, min(int(1.25 * tile_bytes) + (4 << 20), 56 << 20))

    cost = pl.CostEstimate(
        flops=2 * b_pad * (IN_PAD * H1 + H1 * H2 + H2 * OUT_DIM),
        transcendentals=b_pad * OUT_DIM,
        bytes_accessed=(x_p.size * 2 + w1_p.size * 2 + w2_b.size * 2 + w3_b.size * 2
                        + (b1.size + b2.size + b3.size) * 4
                        + b_pad * OUT_DIM * out_dtype.itemsize),
    )

    kernel = functools.partial(_generator_kernel, bf16_epilogue=bf16_epilogue)

    out = pl.pallas_call(
        kernel,
        out_shape=jax.ShapeDtypeStruct((b_pad, OUT_DIM), out_dtype),
        grid=(n_tiles, b_tiles),   # N outer: w3/b3 slice DMA'd once per N tile
        in_specs=[
            pl.BlockSpec((tb_eff, IN_PAD), lambda j, i: (i, 0)),   # streamed x tile
            resident(w1_p), resident(b1),
            resident(w2_b), resident(b2),
            pl.BlockSpec((H2, tn), lambda j, i: (0, j)),           # w3 N-slice
            pl.BlockSpec((1, tn), lambda j, i: (0, j)),            # b3 N-slice
        ],
        out_specs=pl.BlockSpec((tb_eff, tn), lambda j, i: (i, j)),
        compiler_params=pltpu.CompilerParams(
            dimension_semantics=("parallel", "parallel"),  # both axes shardable (v7x 2 TCs)
            vmem_limit_bytes=vmem_bytes,
        ),
        cost_estimate=cost,
    )(x_p, w1_p, b1, w2_b, b2, w3_b, b3)

    return out[:B]


def init_params(key):
    """PyTorch nn.Linear-style init (U[-1/sqrt(fan_in), +1/sqrt(fan_in)]).

    Weights stored [in_features, out_features]; biases [1, out_features].
    """
    keys = jax.random.split(key, 6)

    def linear(kw, kb, fan_in, fan_out):
        bound = 1.0 / jnp.sqrt(jnp.float32(fan_in))
        w = jax.random.uniform(kw, (fan_in, fan_out), jnp.float32, -bound, bound)
        b = jax.random.uniform(kb, (1, fan_out), jnp.float32, -bound, bound)
        return w, b

    w1, b1 = linear(keys[0], keys[1], IN_DIM, H1)
    w2, b2 = linear(keys[2], keys[3], H1, H2)
    w3, b3 = linear(keys[4], keys[5], H2, OUT_DIM)
    return (w1, b1, w2, b2, w3, b3)


def reference_forward(x, params):
    """Pure-JAX f32 reference for correctness check."""
    w1, b1, w2, b2, w3, b3 = params
    h = jnp.maximum(x @ w1 + b1, 0.0)
    h = jnp.maximum(h @ w2 + b2, 0.0)
    h = jnp.tanh(h @ w3 + b3)
    return jnp.maximum(h, 0.0)


if __name__ == "__main__":
    key = jax.random.PRNGKey(0)
    k_params, k_x = jax.random.split(key)

    params = init_params(k_params)
    batch = 8
    x = jax.random.normal(k_x, (batch, IN_DIM), jnp.float32)  # latent noise vector

    out = generator_forward(x, params)
    out = jax.block_until_ready(out)

    ref = reference_forward(x, params)
    assert out.shape == (batch, OUT_DIM), out.shape
    # bf16 matmuls/epilogue/output with f32 accumulation vs f32 reference.
    assert jnp.allclose(out.astype(jnp.float32), ref, atol=2e-2, rtol=2e-2), \
        "mismatch vs JAX reference"

    print("KERNEL_OK")
</pallas_src>

<mosaic_0001>
module attributes {stable_mosaic.version = 11 : i64} {
  func.func @_generator_kernel(%arg0: i32, %arg1: i32, %arg2: memref<16x128xbf16, #tpu.memory_space<vmem>>, %arg3: memref<128x128xbf16, #tpu.memory_space<vmem>>, %arg4: memref<1x128xf32, #tpu.memory_space<vmem>>, %arg5: memref<128x256xbf16, #tpu.memory_space<vmem>>, %arg6: memref<1x256xf32, #tpu.memory_space<vmem>>, %arg7: memref<256x2048xbf16, #tpu.memory_space<vmem>>, %arg8: memref<1x2048xf32, #tpu.memory_space<vmem>>, %arg9: memref<16x2048xbf16, #tpu.memory_space<vmem>>) attributes {dimension_semantics = [#tpu.dimension_semantics<parallel>, #tpu.dimension_semantics<parallel>], iteration_bounds = array<i64: 2, 1>, scalar_prefetch = 0 : i64, scratch_operands = 0 : i64, tpu.core_type = #tpu.core_type<tc>, window_params = [{transform_indices = @transform_0, window_bounds = array<i64: 16, 128>}, {pipeline_mode = #tpu.pipeline_mode<synchronous>, transform_indices = @transform_1, window_bounds = array<i64: 128, 128>}, {pipeline_mode = #tpu.pipeline_mode<synchronous>, transform_indices = @transform_2, window_bounds = array<i64: 1, 128>}, {pipeline_mode = #tpu.pipeline_mode<synchronous>, transform_indices = @transform_3, window_bounds = array<i64: 128, 256>}, {pipeline_mode = #tpu.pipeline_mode<synchronous>, transform_indices = @transform_4, window_bounds = array<i64: 1, 256>}, {transform_indices = @transform_5, window_bounds = array<i64: 256, 2048>}, {transform_indices = @transform_6, window_bounds = array<i64: 1, 2048>}, {transform_indices = @transform_7, window_bounds = array<i64: 16, 2048>}]} {
    %c0 = arith.constant 0 : index
    %c0_0 = arith.constant 0 : index
    %0 = vector.load %arg2[%c0, %c0_0] : memref<16x128xbf16, #tpu.memory_space<vmem>>, vector<16x128xbf16>
    %c0_1 = arith.constant 0 : index
    %c0_2 = arith.constant 0 : index
    %1 = vector.load %arg3[%c0_1, %c0_2] : memref<128x128xbf16, #tpu.memory_space<vmem>>, vector<128x128xbf16>
    %cst = arith.constant dense<0.000000e+00> : vector<16x128xf32>
    %2 = tpu.matmul %0, %1, %cst {dimension_numbers = #tpu.dot_dimension_numbers<[1], [0], [0], [1], [0, 0, 1, 1], [], []>} : vector<16x128xbf16>, vector<128x128xbf16>, vector<16x128xf32> -> vector<16x128xf32>
    %c0_3 = arith.constant 0 : index
    %c0_4 = arith.constant 0 : index
    %3 = vector.load %arg4[%c0_3, %c0_4] : memref<1x128xf32, #tpu.memory_space<vmem>>, vector<1x128xf32>
    %4 = vector.broadcast %3 : vector<1x128xf32> to vector<16x128xf32>
    %5 = arith.addf %2, %4 : vector<16x128xf32>
    %cst_5 = arith.constant 0.000000e+00 : f32
    %6 = vector.broadcast %cst_5 : f32 to vector<16x128xf32>
    %7 = arith.maximumf %5, %6 : vector<16x128xf32>
    %8 = arith.truncf %7 : vector<16x128xf32> to vector<16x128xbf16>
    %c0_6 = arith.constant 0 : index
    %c0_7 = arith.constant 0 : index
    %9 = vector.load %arg5[%c0_6, %c0_7] : memref<128x256xbf16, #tpu.memory_space<vmem>>, vector<128x256xbf16>
    %cst_8 = arith.constant dense<0.000000e+00> : vector<16x256xf32>
    %10 = tpu.matmul %8, %9, %cst_8 {dimension_numbers = #tpu.dot_dimension_numbers<[1], [0], [0], [1], [0, 0, 1, 1], [], []>} : vector<16x128xbf16>, vector<128x256xbf16>, vector<16x256xf32> -> vector<16x256xf32>
    %c0_9 = arith.constant 0 : index
    %c0_10 = arith.constant 0 : index
    %11 = vector.load %arg6[%c0_9, %c0_10] : memref<1x256xf32, #tpu.memory_space<vmem>>, vector<1x256xf32>
    %12 = vector.broadcast %11 : vector<1x256xf32> to vector<16x256xf32>
    %13 = arith.addf %10, %12 : vector<16x256xf32>
    %cst_11 = arith.constant 0.000000e+00 : f32
    %14 = vector.broadcast %cst_11 : f32 to vector<16x256xf32>
    %15 = arith.maximumf %13, %14 : vector<16x256xf32>
    %16 = arith.truncf %15 : vector<16x256xf32> to vector<16x256xbf16>
    %c0_12 = arith.constant 0 : index
    %c0_13 = arith.constant 0 : index
    %17 = vector.load %arg7[%c0_12, %c0_13] : memref<256x2048xbf16, #tpu.memory_space<vmem>>, vector<256x2048xbf16>
    %cst_14 = arith.constant dense<0.000000e+00> : vector<16x2048xf32>
    %18 = tpu.matmul %16, %17, %cst_14 {dimension_numbers = #tpu.dot_dimension_numbers<[1], [0], [0], [1], [0, 0, 1, 1], [], []>} : vector<16x256xbf16>, vector<256x2048xbf16>, vector<16x2048xf32> -> vector<16x2048xf32>
    %c0_15 = arith.constant 0 : index
    %c0_16 = arith.constant 0 : index
    %19 = vector.load %arg8[%c0_15, %c0_16] : memref<1x2048xf32, #tpu.memory_space<vmem>>, vector<1x2048xf32>
    %20 = vector.broadcast %19 : vector<1x2048xf32> to vector<16x2048xf32>
    %21 = arith.addf %18, %20 : vector<16x2048xf32>
    %22 = arith.truncf %21 : vector<16x2048xf32> to vector<16x2048xbf16>
    %23 = math.tanh %22 : vector<16x2048xbf16>
    %cst_17 = arith.constant 0.000000e+00 : bf16
    %24 = vector.broadcast %cst_17 : bf16 to vector<16x2048xbf16>
    %25 = arith.maximumf %23, %24 : vector<16x2048xbf16>
    %c0_18 = arith.constant 0 : index
    %c0_19 = arith.constant 0 : index
    %26 = vector.load %arg9[%c0_18, %c0_19] : memref<16x2048xbf16, #tpu.memory_space<vmem>>, vector<16x2048xbf16>
    tpu.vector_store %arg9[%c0_18, %c0_19], %25 {strides = array<i32>} : memref<16x2048xbf16, #tpu.memory_space<vmem>>, vector<16x2048xbf16>,
    return
  }
  func.func @transform_0(%arg0: i32, %arg1: i32) -> (i32, i32) {
    %c0_i32 = arith.constant 0 : i32
    %c0_i32_0 = arith.constant 0 : i32
    return %arg1, %c0_i32 : i32, i32
  }
  func.func @transform_1(%arg0: i32, %arg1: i32) -> (i32, i32) {
    %c0_i32 = arith.constant 0 : i32
    %c0_i32_0 = arith.constant 0 : i32
    %c0_i32_1 = arith.constant 0 : i32
    return %c0_i32, %c0_i32_0 : i32, i32
  }
  func.func @transform_2(%arg0: i32, %arg1: i32) -> (i32, i32) {
    %c0_i32 = arith.constant 0 : i32
    %c0_i32_0 = arith.constant 0 : i32
    %c0_i32_1 = arith.constant 0 : i32
    return %c0_i32, %c0_i32_0 : i32, i32
  }
  func.func @transform_3(%arg0: i32, %arg1: i32) -> (i32, i32) {
    %c0_i32 = arith.constant 0 : i32
    %c0_i32_0 = arith.constant 0 : i32
    %c0_i32_1 = arith.constant 0 : i32
    return %c0_i32, %c0_i32_0 : i32, i32
  }
  func.func @transform_4(%arg0: i32, %arg1: i32) -> (i32, i32) {
    %c0_i32 = arith.constant 0 : i32
    %c0_i32_0 = arith.constant 0 : i32
    %c0_i32_1 = arith.constant 0 : i32
    return %c0_i32, %c0_i32_0 : i32, i32
  }
  func.func @transform_5(%arg0: i32, %arg1: i32) -> (i32, i32) {
    %c0_i32 = arith.constant 0 : i32
    %c0_i32_0 = arith.constant 0 : i32
    return %c0_i32, %arg0 : i32, i32
  }
  func.func @transform_6(%arg0: i32, %arg1: i32) -> (i32, i32) {
    %c0_i32 = arith.constant 0 : i32
    %c0_i32_0 = arith.constant 0 : i32
    return %c0_i32, %arg0 : i32, i32
  }
  func.func @transform_7(%arg0: i32, %arg1: i32) -> (i32, i32) {
    %c0_i32 = arith.constant 0 : i32
    return %arg1, %arg0 : i32, i32
  }
}

</mosaic_0001>

<bundles_post_ra>
// kernel: tpu_custom_call.1
= control target key start
LH: loop header
LB: loop body
LE: loop exit
PB: predicated region body
PF: predicated region fallthrough
CT: control target
= control target key end

     0   :  { %s4610_s0 = inlined_call_operand.hbm [shape: bf16[16,128], index: 0, kind: input, shape index: {}]   ;;  %s4611_s1 = inlined_call_operand.hbm [shape: bf16[128,128], index: 1, kind: input, shape index: {}]   ;;  %s4612_s2 = inlined_call_operand.hbm [shape: f32[1,128], index: 2, kind: input, shape index: {}]   ;;  %s4613_s3 = inlined_call_operand.hbm [shape: bf16[128,256], index: 3, kind: input, shape index: {}]   ;;  %s4614_s4 = inlined_call_operand.hbm [shape: f32[1,256], index: 4, kind: input, shape index: {}]   ;;  %s4615_s5 = inlined_call_operand.hbm [shape: bf16[256,4096], index: 5, kind: input, shape index: {}]   ;;  %s4616_s6 = inlined_call_operand.hbm [shape: f32[1,4096], index: 6, kind: input, shape index: {}]   ;;  %s4617_s7 = inlined_call_operand.hbm [shape: bf16[16,4096], index: 7, kind: output, shape index: {}]  }
   0x1   :  { %4639 = sst [smem:[#allocation26_spill]] %s4611_s1 }
   0x2   :  { %4640 = sst [smem:[#allocation27_spill]] %s4613_s3 }
   0x3   :  { %4641 = sst [smem:[#allocation28_spill]] %s4615_s5 }
   0x4   :  { %4642 = sst [smem:[#allocation29_spill]] %s4617_s7 }
   0x5   :  { %12 = vsyncpa [#allocation3], 0 }
   0x6   :  { %13 = vsyncpa [#allocation6], 0 }
   0x7   :  { %14 = vsyncpa [#allocation9], 0 }
   0x8   :  { %15 = vsyncpa [#allocation12], 0 }
   0x9   :  { %17 = vsyncpa [#allocation12 + $0x1], 0 }
   0xa   :  { %18 = vsyncpa [#allocation4], 0 }
   0xb   :  { %20 = vsyncpa [#allocation4 + $0x1], 0  ;;  %s3900_s24 = smov 0   ;;  %s3902_s25 = smov 0  }
   0xc   :  { %s3904_s26 = smov 0   ;;  %s3906_s27 = smov 0  }
   0xd   :  { %s3908_s28 = smov 0   ;;  %s3910_s29 = smov 0  }
   0xe LB: > { %4643 = sst [smem:[#allocation20_spill]] %s3818_s24  ;;  %s3931_s30 = sadd.s32 4294967295, %s3838_s29   ;;  %s3838_s29 = sphi %s3910_s29, %s26_s29   ;;  %s3834_s28 = sphi %s3908_s28, %s4689_s28   ;;  %s3830_s27 = sphi %s3906_s27, %s4688_s27   ;;  %s3826_s26 = sphi %s3904_s26, %s4687_s26   ;;  %s3822_s25 = sphi %s3902_s25, %s4686_s25   ;;  %s3818_s24 = sphi %s3900_s24, %s4685_s24  }
   0xf   : > { %4644 = sst [smem:[#allocation21_spill]] %s3838_s29  ;;  %s2991_s8 = sadd.s32 4294967294, %s3838_s29  }
  0x10   : > { %p168_p0 = scmp.ne.s32.totalorder %s3822_s25, %s3818_s24  ;;  %p4618_p1 = scmp.eq.s32.totalorder %s3931_s30, 0 }
  0x11   : > { %p226_p3 = scmp.eq.s32.totalorder %s2991_s8, 1  ;;  %p2992_p5 = scmp.ge.s32.totalorder %s3838_s29, 1 }
  0x12   : > { %p3940_p4 = por %p4618_p1, %p168_p0  ;;  %p233_p7 = scmp.lt.s32.totalorder %s3838_s29, 3 }
  0x13   : > { %p3945_p6 = por %p226_p3, %p168_p0  ;;  %s3840_s12 = smov [#allocation5]  }
  0x14   : > { %s4645_s9 = scalar_select %p3940_p4, 1, 0 }
  0x15   : > { %s4646_s10 = scalar_select %p3945_p6, 1, 0 }
  0x16   : > { %p3950_p8 = pnand %p2992_p5, %p233_p7  ;;  %s261_s13 = sshll.u32 %s3840_s12, 4  ;;  %s262_s13 = int_to_ptr.vmem [resolvable:$true] %s261_s13 }
  0x17   : > { %4647 = sst [smem:[#allocation22_spill]] %s4646_s10  ;;  %s3841_s15 = smov [#allocation8]  }
  0x18   : > { %s4648_s11 = scalar_select %p3950_p8, 1, 0 }
  0x19   : > { %p3375_p10 = pneg %p3950_p8  ;;  %s285_s16 = sshll.u32 %s3841_s15, 4  ;;  %s3963_s16 = int_to_ptr.vmem [resolvable:$true] %s285_s16 }
  0x1a   : > { %s4650_s1 = sld [smem:[#allocation26_spill]] }
  0x1b   : > { %p3959_p11 = pnand %p3375_p10, %p4618_p1 }
  0x1d   : > { %s4649_s14 = scalar_select %p3959_p11, 1, 0 }
  0x1e   : > { %p3973_p13 = pneg %p3959_p11 }
  0x20   : > { %s3544_s19 = scalar_lea.hbm %s4650_s1, 1024 }
  0x21   : > { %p3545_p12 = scmp.ne.s32.totalorder %s4650_s1, %s3544_s19  ;;  %p3551_p5 = scmp.lt.u32.totalorder %s3544_s19, %s4650_s1 }
  0x23   : > { %p3547_p0 = pnand %p3973_p13, %p3545_p12 }
  0x25   : > { %p3548_p3 = pneg %p3547_p0 }
  0x27   : > { %p3553_p7 = pnand %p3551_p5, %p3548_p3 }
  0x29   : > { %3556 = shalt.err (!%p3553_p7)
}
  0x2a   : > { %s3557_s12 = scalar_lea.vmem %s262_s13, 1024  ;;  %p3565_p2 = scmp.lt.s32.totalorder %s262_s13, %s262_s13 }
  0x2b   : > { %p3558_p10 = scmp.ne.s32.totalorder %s262_s13, %s3557_s12  ;;  %p3566_p6 = scmp.lt.s32.totalorder %s3557_s12, %s3557_s12 }
  0x2d   : > { %p3560_p9 = pnand %p3558_p10, %p3973_p13  ;;  %p3567_p4 = por %p3566_p6, %p3565_p2 }
  0x2f   : > { %p3561_p1 = pneg %p3560_p9 }
  0x31   : > { %p3568_p8 = pnand %p3567_p4, %p3561_p1 }
  0x33   : > { %3571 = shalt.err (!%p3568_p8)
}
  0x34   : > { %s4624_s15 = smov 64   ;;  %s4623_s17 = smov 4  }
  0x35   : > { %3381 = dma.hbm_to_vmem [thread:$0]  (!%p3959_p11), %s4650_s1, 1024, %s262_s13, [#allocation6], %s4624_s15, %s4624_s15, %s4623_s17  }
  0x36   : > { %s4652_s3 = sld [smem:[#allocation27_spill]] }
  0x3c   : > { %s3572_s23 = scalar_lea.hbm %s4652_s3, 2048 }
  0x3d   : > { %p3573_p1 = scmp.ne.s32.totalorder %s4652_s3, %s3572_s23  ;;  %p3579_p6 = scmp.lt.u32.totalorder %s3572_s23, %s4652_s3 }
  0x3f   : > { %p3575_p2 = pnand %p3573_p1, %p3973_p13 }
  0x41   : > { %p3576_p4 = pneg %p3575_p2 }
  0x43   : > { %p3581_p8 = pnand %p3579_p6, %p3576_p4 }
  0x45   : > { %3584 = shalt.err (!%p3581_p8)
}
  0x46   : > { %s3585_s13 = scalar_lea.vmem %s3963_s16, 2048  ;;  %p3593_p3 = scmp.lt.s32.totalorder %s3963_s16, %s3963_s16 }
  0x47   : > { %p3586_p9 = scmp.ne.s32.totalorder %s3963_s16, %s3585_s13  ;;  %p3594_p5 = scmp.lt.s32.totalorder %s3585_s13, %s3585_s13 }
  0x49   : > { %p3588_p12 = pnand %p3586_p9, %p3973_p13  ;;  %p3595_p7 = por %p3594_p5, %p3593_p3 }
  0x4b   : > { %p3589_p0 = pneg %p3588_p12 }
  0x4d   : > { %p3596_p10 = pnand %p3595_p7, %p3589_p0 }
  0x4f   : > { %3599 = shalt.err (!%p3596_p10)
}
  0x50   : > { %s3844_s18 = smov 128   ;;  %s3845_s24 = smov 8  }
  0x51   : > { %3387 = dma.hbm_to_vmem [thread:$0]  (!%p3959_p11), %s4652_s3, 2048, %s3963_s16, [#allocation9], %s3844_s18, %s3844_s18, %s3845_s24  }
  0x52   : > { %s38_s20 = sadd.s32 1, %s3834_s28  ;;  %s155_s21 = sadd.s32 1, %s3826_s26 }
  0x53   : > { %p40_p1 = scmp.ge.s32.totalorder %s38_s20, 2  ;;  %p162_p2 = scmp.ne.s32.totalorder %s3826_s26, %s3822_s25 }
  0x54   : > { %p163_p4 = scmp.eq.s32.totalorder %s3838_s29, 0  ;;  %p3407_p6 = scmp.lt.s32.totalorder %s3838_s29, 2 }
  0x55   : > { %s4691_s20 = smov (%p40_p1, %s38_s20), 0  ;;  %p4654_p9 = scmp.eq.s32.totalorder %s3931_s30, 1 }
  0x56   : > { %4653 = sst [smem:[#allocation23_spill]] %s4691_s20  ;;  %p164_p8 = por %p163_p4, %p162_p2 }
  0x57   : > { %p4025_p12 = por %p4654_p9, %p162_p2  ;;  %s152_s8 = ssub.s32 %s3834_s28, %s4691_s20 }
  0x58   : > { %s310_s12 = sand.u32 1, %s3838_s29   ;;  %p153_p0 = scmp.eq.s32.totalorder %s152_s8, 0 }
  0x59   : > { %s4655_s23 = scalar_select %p4025_p12, 1, 0 }
  0x5a   : > { %s4626_s16 = sand.u32 1, %s3826_s26   ;;  %s3317_s13 = sshll.u32 %s3834_s28, 10 }
  0x5b   : > { %4656 = sst [smem:[#allocation24_spill]] %s4655_s23  ;;  %s2999_s24 = sshll.u32 %s4626_s16, 11 }
  0x5c   : > { %s4035_s18 = scalar_select %p153_p0, %s3826_s26, %s155_s21  }
  0x5d   : > { %s4658_s5 = sld [smem:[#allocation28_spill]]  ;;  %p4044_p3 = pnand %p3407_p6, %p164_p8 }
  0x5e   : > { %4657 = sst [smem:[#allocation25_spill]] %s4035_s18  ;;  %s314_s8 = scalar_lea.vmem [#allocation11], %s2999_s24 }
  0x5f   : > { %s4659_s15 = scalar_select %p4044_p3, 1, 0 }
  0x60   : > { %s321_s21 = sshll.u32 %s314_s8, 4  ;;  %s4050_s16 = scalar_lea.sflag [#allocation12], %s310_s12  ;;  %s4048_s21 = int_to_ptr.vmem [resolvable:$true] %s321_s21 }
  0x61   : > { %p4636_p7 = pneg %p4044_p3 }
  0x63   : > { %s4042_s17 = scalar_lea.hbm %s4658_s5, %s3317_s13  ;;  %s3605_s19 = scalar_lea.hbm %s4658_s5, 65536 }
  0x64   : > { %s3600_s1 = scalar_lea.hbm %s4042_s17, 32768  ;;  %p3606_p2 = scmp.lt.u32.totalorder %s4042_s17, %s4658_s5 }
  0x65   : > { %p3601_p5 = scmp.ne.s32.totalorder %s4042_s17, %s3600_s1  ;;  %p3607_p4 = scmp.lt.u32.totalorder %s3605_s19, %s3600_s1 }
  0x66   : > { %p3609_p8 = scmp.lt.u32.totalorder %s3600_s1, %s4042_s17 }
  0x67   : > { %p3603_p10 = pnand %p4636_p7, %p3601_p5  ;;  %p3608_p6 = por %p3607_p4, %p3606_p2 }
  0x69   : > { %p3604_p1 = pneg %p3603_p10  ;;  %p3610_p9 = por %p3609_p8, %p3608_p6 }
  0x6b   : > { %p3611_p0 = pnand %p3610_p9, %p3604_p1 }
  0x6d   : > { %3614 = shalt.err (!%p3611_p0)
}
  0x6e   : > { %s3615_s12 = scalar_lea.vmem %s4048_s21, 32768  ;;  %s3846_s24 = smov [#allocation11]  }
  0x6f   : > { %p3616_p5 = scmp.ne.s32.totalorder %s4048_s21, %s3615_s12  ;;  %s3620_s8 = sshll.u32 %s3846_s24, 4  ;;  %s3621_s8 = int_to_ptr.vmem [resolvable:$false] %s3620_s8 }
  0x70   : > { %s3622_s3 = scalar_lea.vmem %s3621_s8, 65536  ;;  %p3623_p11 = scmp.lt.s32.totalorder %s4048_s21, %s3621_s8 }
  0x71   : > { %p3618_p10 = pnand %p3616_p5, %p4636_p7  ;;  %p3624_p2 = scmp.lt.s32.totalorder %s3622_s3, %s3615_s12 }
  0x73   : > { %p3619_p12 = pneg %p3618_p10  ;;  %p3625_p4 = por %p3624_p2, %p3623_p11 }
  0x75   : > { %p3626_p6 = pnand %p3625_p4, %p3619_p12 }
  0x77   : > { %3629 = shalt.err (!%p3626_p6)
}
  0x78   : > { %s3847_s1 = smov 2048   ;;  %s3848_s20 = smov 1024  }
  0x79   : > { %s4660_s13 = smov 64   ;;  %s3849_s10 = smov [#allocation2]  }
  0x7a   : > { %3394 = dma.hbm_to_vmem [thread:$0]  (!%p4044_p3), %s4042_s17, 32768, %s4048_s21, %s4050_s16, %s3847_s1, %s3848_s20, %s4660_s13  }
  0x7b   : > { %s248_s19 = sshll.u32 %s3849_s10, 4  ;;  %s3850_s24 = smov [#allocation7]   ;;  %s249_s19 = int_to_ptr.vmem [resolvable:$true] %s248_s19 }
  0x7c   : > { %s275_s5 = sshll.u32 %s3850_s24, 4  ;;  %s3630_s3 = scalar_lea.hbm %s4610_s0, 128  ;;  %s276_s5 = int_to_ptr.vmem [resolvable:$true] %s275_s5 }
  0x7d   : > { %p3631_p11 = scmp.ne.s32.totalorder %s4610_s0, %s3630_s3  ;;  %p3637_p8 = scmp.lt.u32.totalorder %s3630_s3, %s4610_s0 }
  0x7f   : > { %p3633_p12 = pnand %p3631_p11, %p3973_p13 }
  0x81   : > { %p3634_p1 = pneg %p3633_p12 }
  0x83   : > { %p3639_p9 = pnand %p3637_p8, %p3634_p1 }
  0x85   : > { %3642 = shalt.err (!%p3639_p9)
}
  0x86   : > { %s3643_s17 = scalar_lea.vmem %s249_s19, 128  ;;  %p3651_p2 = scmp.lt.s32.totalorder %s249_s19, %s249_s19 }
  0x87   : > { %p3644_p0 = scmp.ne.s32.totalorder %s249_s19, %s3643_s17  ;;  %p3652_p4 = scmp.lt.s32.totalorder %s3643_s17, %s3643_s17 }
  0x89   : > { %p3646_p5 = pnand %p3644_p0, %p3973_p13  ;;  %p3653_p6 = por %p3652_p4, %p3651_p2 }
  0x8b   : > { %p3647_p10 = pneg %p3646_p5 }
  0x8d   : > { %p3654_p7 = pnand %p3653_p6, %p3647_p10 }
  0x8f   : > { %3657 = shalt.err (!%p3654_p7)
}
  0x90   : > { %p4661_p11 = scmp.ne.s32.totalorder %s4649_s14, 0  ;;  %s4662_s29 = smov 4  }
  0x91   : > { %s3658_s1 = scalar_lea.hbm %s4612_s2, 16 }
  0x92   : > { %3378 = dma.hbm_to_vmem [thread:$0]  (!%p4661_p11), %s4610_s0, 128, %s249_s19, [#allocation3], %s4660_s13, %s4660_s13, %s4662_s29  }
  0x93   : > { %p3659_p12 = scmp.ne.s32.totalorder %s4612_s2, %s3658_s1  ;;  %p3665_p8 = scmp.lt.u32.totalorder %s3658_s1, %s4612_s2 }
  0x95   : > { %p3661_p7 = pnand %p3659_p12, %p3973_p13 }
  0x97   : > { %p3662_p1 = pneg %p3661_p7 }
  0x99   : > { %p3667_p9 = pnand %p3665_p8, %p3662_p1 }
  0x9b   : > { %3670 = shalt.err (!%p3667_p9)
}
  0x9c   : > { %s3671_s12 = scalar_lea.vmem %s276_s5, 16  ;;  %s3678_s13 = scalar_lea.vmem %s276_s5, 32 }
  0x9d   : > { %p3672_p0 = scmp.ne.s32.totalorder %s276_s5, %s3671_s12  ;;  %p3679_p2 = scmp.lt.s32.totalorder %s276_s5, %s276_s5 }
  0x9e   : > { %p3680_p4 = scmp.lt.s32.totalorder %s3678_s13, %s3671_s12 }
  0x9f   : > { %p3674_p5 = pnand %p3672_p0, %p3973_p13 }
  0xa0   : > { %p3681_p6 = por %p3680_p4, %p3679_p2 }
  0xa1   : > { %p3675_p10 = pneg %p3674_p5 }
  0xa3   : > { %p3682_p3 = pnand %p3681_p6, %p3675_p10 }
  0xa5   : > { %3685 = shalt.err (!%p3682_p3)
}
  0xa6   : > { %3384 = dma.hbm_to_vmem [thread:$0]  (!%p4661_p11), %s4612_s2, 16, %s276_s5, [#allocation6]  }
  0xa7   : > { %s3851_s17 = smov [#allocation10]   ;;  %s4663_s7 = sand.u32 1, %s3826_s26  }
  0xa8   : > { %s299_s29 = sshll.u32 %s3851_s17, 4  ;;  %s3002_s23 = sshll.u32 %s4663_s7, 4  ;;  %s300_s29 = int_to_ptr.vmem [resolvable:$true] %s299_s29 }
  0xa9   : > { %s3686_s1 = scalar_lea.hbm %s4614_s4, 32 }
  0xaa   : > { %p3687_p3 = scmp.ne.s32.totalorder %s4614_s4, %s3686_s1  ;;  %p3693_p1 = scmp.lt.u32.totalorder %s3686_s1, %s4614_s4 }
  0xac   : > { %p3689_p12 = pnand %p3687_p3, %p3973_p13 }
  0xae   : > { %p3690_p7 = pneg %p3689_p12 }
  0xb0   : > { %p3695_p8 = pnand %p3693_p1, %p3690_p7 }
  0xb2   : > { %3698 = shalt.err (!%p3695_p8)
}
  0xb3   : > { %s3699_s5 = scalar_lea.vmem %s300_s29, 32  ;;  %p3707_p10 = scmp.lt.s32.totalorder %s300_s29, %s300_s29 }
  0xb4   : > { %p3700_p9 = scmp.ne.s32.totalorder %s300_s29, %s3699_s5  ;;  %p3708_p2 = scmp.lt.s32.totalorder %s3699_s5, %s3699_s5 }
  0xb6   : > { %p3702_p0 = pnand %p3700_p9, %p3973_p13  ;;  %p3709_p4 = por %p3708_p2, %p3707_p10 }
  0xb8   : > { %p3703_p5 = pneg %p3702_p0 }
  0xba   : > { %p3710_p6 = pnand %p3709_p4, %p3703_p5 }
  0xbc   : > { %3713 = shalt.err (!%p3710_p6)
}
  0xbd   : > { %3390 = dma.hbm_to_vmem [thread:$0]  (!%p4661_p11), %s4614_s4, 32, %s300_s29, [#allocation9]  }
  0xbe   : > { %s3318_s19 = sshll.u32 %s3834_s28, 8  ;;  %s335_s3 = scalar_lea.vmem [#allocation13], %s3002_s23 }
  0xbf   : > { %s343_s17 = sshll.u32 %s335_s3, 4  ;;  %s341_s18 = scalar_lea.hbm %s4616_s6, %s3318_s19  ;;  %s344_s17 = int_to_ptr.vmem [resolvable:$true] %s343_s17 }
  0xc0   : > { %s3714_s21 = scalar_lea.hbm %s341_s18, 256  ;;  %p4664_p3 = scmp.ne.s32.totalorder %s4659_s15, 0 }
  0xc1   : > { %p3715_p13 = scmp.ne.s32.totalorder %s341_s18, %s3714_s21  ;;  %s3719_s20 = scalar_lea.hbm %s4616_s6, 512 }
  0xc2   : > { %p4665_p12 = pneg %p4664_p3  ;;  %p3720_p11 = scmp.lt.u32.totalorder %s341_s18, %s4616_s6 }
  0xc3   : > { %p3721_p8 = scmp.lt.u32.totalorder %s3719_s20, %s3714_s21  ;;  %p3723_p0 = scmp.lt.u32.totalorder %s3714_s21, %s341_s18 }
  0xc4   : > { %p3717_p7 = pnand %p3715_p13, %p4665_p12 }
  0xc5   : > { %p3722_p9 = por %p3721_p8, %p3720_p11 }
  0xc6   : > { %p3718_p1 = pneg %p3717_p7 }
  0xc7   : > { %p3724_p5 = por %p3723_p0, %p3722_p9 }
  0xc9   : > { %p3725_p10 = pnand %p3724_p5, %p3718_p1 }
  0xcb   : > { %3728 = shalt.err (!%p3725_p10)
}
  0xcc   : > { %s3729_s23 = scalar_lea.vmem %s344_s17, 256  ;;  %p4666_p4 = pmov %p4665_p12 }
  0xcd   : > { %p3730_p2 = scmp.ne.s32.totalorder %s344_s17, %s3729_s23  ;;  %s3852_s24 = smov [#allocation13]  }
  0xce   : > { %s3734_s8 = sshll.u32 %s3852_s24, 4  ;;  %s3735_s8 = int_to_ptr.vmem [resolvable:$false] %s3734_s8 }
  0xcf   : > { %p3732_p6 = pnand %p3730_p2, %p4666_p4  ;;  %s3736_s5 = scalar_lea.vmem %s3735_s8, 512 }
  0xd0   : > { %p3737_p12 = scmp.lt.s32.totalorder %s344_s17, %s3735_s8  ;;  %p3738_p7 = scmp.lt.s32.totalorder %s3736_s5, %s3729_s23 }
  0xd1   : > { %p3733_p13 = pneg %p3732_p6 }
  0xd2   : > { %p3739_p8 = por %p3738_p7, %p3737_p12 }
  0xd4   : > { %p3740_p11 = pnand %p3739_p8, %p3733_p13 }
  0xd6   : > { %3743 = shalt.err (!%p3740_p11)
}
  0xd7   : > { %3397 = dma.hbm_to_vmem [thread:$0]  (!%p4664_p3), %s341_s18, 256, %s344_s17, %s4050_s16  }
  0xd8   : > { %p4667_p1 = scmp.ne.s32.totalorder %s4648_s11, 0 }
  0xd9   : > { %p4668_p9 = scmp.eq.s32.totalorder (!%p4667_p1), %s3931_s30, 0 }
  0xda   : > { %352 = sbr.rel (%p4667_p1) target bundleno = 1158 (0x486), region = 48 }
  0xe1   : > { %3797 = dma.done.wait (%p4668_p9), [#allocation3], 128   ;;  %p4669_p0 = pmov %p4668_p9 }
  0xe3   : > { %3799 = vsyncadd (%p4669_p0), [#allocation3], 4294967168  ;;  %p4670_p5 = pmov %p4669_p0 }
  0xe4   : > { %p4671_p10 = pmov %p4669_p0 }
  0xe5   : > { %3801 = dma.done.wait (%p4670_p5), [#allocation6], 1040  }
  0xe6   : > { %3803 = vsyncadd (%p4671_p10), [#allocation6], 4294966256  ;;  %p4672_p2 = pmov %p4669_p0 }
  0xe7   : > { %p4673_p3 = pmov %p4669_p0 }
  0xe8   : > { %3805 = dma.done.wait (%p4672_p2), [#allocation9], 2080  }
  0xe9   : > { %3807 = vsyncadd (%p4673_p3), [#allocation9], 4294965216  ;;  %s374_s11 = sand.u32 1, %s3931_s30   ;;  %s4173_s15 = sand.u32 1, %s3822_s25  }
  0xea   : > { %s3011_s16 = sshll.u32 %s4173_s15, 11  ;;  %s375_s12 = scalar_lea.sflag [#allocation12], %s374_s11 }
  0xeb   : > { %s4176_s13 = scalar_lea.vmem [#allocation11], %s3011_s16  ;;  %p4674_p4 = scmp.ne.s32.totalorder %s4645_s9, 0 }
  0xed   : > { %3809 = dma.done.wait (%p4674_p4), %s375_s12, 33024  }
  0xee   : > { %3811 = vsyncadd (%p4674_p4), %s375_s12, 4294934272  ;;  %v3853_v0 = vmov 0.0   ;;  %vm3854_vm0 = vmmov 0   ;;  %v3479_v1 = vld [vmem:[#allocation5] sm:$0xff]   ;;  %v3480_v2 = vld [vmem:[#allocation5 + $0x8] sm:$0xff]   ;;  %v3855_v26 = vmov 0  }
  0xef   : > { %3329 = vmatprep.subr.bf16.mxu0 %v3853_v0  ;;  %3345 = vmatprep.mubr.msk.bf16.mxu0 %vm3854_vm0, %v3853_v0  ;;  %v3481_v3 = vld [vmem:[#allocation5 + $0x10] sm:$0xff]   ;;  %v3482_v4 = vld [vmem:[#allocation5 + $0x18] sm:$0xff]   ;;  %v3490_v6 = vld [vmem:[#allocation8] ss:$8 sps:$4 sm:$0xff]   ;;  %s3012_s30 = sshll.u32 %s4173_s15, 4  ;;  %s3013_s19 = sshll.u32 %s4173_s15, 7 }
  0xf0   : > { %3330 = vmatpush3.bf16.msra.mxu0 %v3479_v1  ;;  %v3488_v5 = vld [vmem:[#allocation8 + $0x4] ss:$8 sps:$4 sm:$0xff]   ;;  %v3491_v7 = vld [vmem:[#allocation8 + $0x14] ss:$8 sps:$4 sm:$0xff]   ;;  %v3493_v8 = vld [vmem:[#allocation8 + $0x10] ss:$8 sps:$4 sm:$0xff]   ;;  %692 = vmatprep.mubr.bf16.mxu1 %v3855_v26 }
  0xf1   : > { %3331 = vmatprep.subr.bf16.mxu0 %v3853_v0  ;;  %660 = vmatprep.subr.bf16.mxu1 %v3488_v5  ;;  %v3494_v9 = vld [vmem:[#allocation8 + $0x24] ss:$8 sps:$4 sm:$0xff]   ;;  %v3496_v11 = vld [vmem:[#allocation8 + $0x20] ss:$8 sps:$4 sm:$0xff]   ;;  %v3497_v12 = vld [vmem:[#allocation8 + $0x34] ss:$8 sps:$4 sm:$0xff]  }
  0xf2   : > { %661 = vmatpush1.bf16.msra.mxu1 %v3490_v6  ;;  %v3483_v10 = vld [vmem:[#allocation5 + $0x20] sm:$0xff]   ;;  %v3484_v13 = vld [vmem:[#allocation5 + $0x28] sm:$0xff]   ;;  %v3499_v14 = vld [vmem:[#allocation8 + $0x30] ss:$8 sps:$4 sm:$0xff]   ;;  %s4482_s9 = scalar_lea.vmem [#allocation13], %s3012_s30  ;;  %s4497_s3 = scalar_lea.vmem [#allocation14], %s3013_s19 }
  0xf3   : > { %662 = vmatprep.subr.bf16.mxu1 %v3491_v7  ;;  %v3500_v15 = vld [vmem:[#allocation8 + $0x44] ss:$8 sps:$4 sm:$0xff]   ;;  %v3502_v17 = vld [vmem:[#allocation8 + $0x40] ss:$8 sps:$4 sm:$0xff]   ;;  %v3503_v18 = vld [vmem:[#allocation8 + $0x54] ss:$8 sps:$4 sm:$0xff]  }
  0xf4   : > { %3332 = vmatpush3.bf16.msra.mxu0 %v3480_v2  ;;  %v3485_v16 = vld [vmem:[#allocation5 + $0x30] sm:$0xff]   ;;  %v3486_v19 = vld [vmem:[#allocation5 + $0x38] sm:$0xff]   ;;  %v3508_v23 = vld [vmem:[#allocation8 + $0x60] ss:$8 sps:$4 sm:$0xff]   ;;  %s3319_s17 = sshll.u32 %s3830_s27, 10  ;;  %s2834_s7 = sshll.u32 %s4497_s3, 4  ;;  %s4557_s7 = int_to_ptr.vmem [resolvable:$true] %s2834_s7 }
  0xf5   : > { %3333 = vmatprep.subr.bf16.mxu0 %v3853_v0  ;;  %v3505_v20 = vld [vmem:[#allocation8 + $0x50] ss:$8 sps:$4 sm:$0xff]   ;;  %v3506_v22 = vld [vmem:[#allocation8 + $0x64] ss:$8 sps:$4 sm:$0xff]   ;;  %v3509_v24 = vld [vmem:[#allocation8 + $0x74] ss:$8 sps:$4 sm:$0xff]  }
  0xf6   : > { %663 = vmatpush1.bf16.msra.mxu1 %v3493_v8  ;;  %v3487_v21 = vld [vmem:[#allocation2] sm:$0xff]   ;;  %v709_v27 = vld [vmem:[%s4176_s13] sm:$0xff]  ;;  %v4186_v29 = vld [vmem:[%s4176_s13 + $0x8] sm:$0xff]  ;;  %s4675_s22 = sld [smem:[#allocation24_spill]]  ;;  %s4676_s14 = sld [smem:[#allocation29_spill]] }
  0xf7   : > { %664 = vmatprep.subr.bf16.mxu1 %v3494_v9  ;;  %v3511_v25 = vld [vmem:[#allocation8 + $0x70] ss:$8 sps:$4 sm:$0xff]   ;;  %v717_v28 = vld [vmem:[%s4176_s13 + $0x40] sm:$0xff]  ;;  %s2818_s27 = scalar_lea.sflag [#allocation4], %s4173_s15  ;;  %s3744_s20 = scalar_lea.vmem %s4557_s7, 2048 }
  0xf8   : > { %3334 = vmatpush3.bf16.msra.mxu0 %v3481_v3  ;;  %v3040_v30 = vcombine.low %v709_v27, %v717_v28  ;;  %v3041_v31 = vcombine.high %v709_v27, %v717_v28  ;;  %v4189_v32 = vld [vmem:[%s4176_s13 + $0x48] sm:$0xff]  ;;  %v725_v33 = vld [vmem:[%s4176_s13 + $0x80] sm:$0xff]  ;;  %p3745_p6 = scmp.ne.s32.totalorder %s4557_s7, %s3744_s20  ;;  %s3856_s10 = smov [#allocation14]  }
  0xf9   : > { %3335 = vmatprep.subr.bf16.mxu0 %v3853_v0  ;;  %v733_v34 = vld [vmem:[%s4176_s13 + $0xc0] sm:$0xff]  ;;  %v3042_v35 = vcombine.low %v4186_v29, %v4189_v32  ;;  %v3043_v36 = vcombine.high %v4186_v29, %v4189_v32  ;;  %v790_v32 = vld [vmem:[%s4176_s13 + $0x288] sm:$0xff]  ;;  %s3748_s29 = sshll.u32 %s3856_s10, 4  ;;  %s3749_s29 = int_to_ptr.vmem [resolvable:$false] %s3748_s29 }
  0xfa   : > { %665 = vmatpush1.bf16.msra.mxu1 %v3496_v11  ;;  %v3057_v37 = vcombine.high %v725_v33, %v733_v34  ;;  %v3056_v38 = vcombine.low %v725_v33, %v733_v34  ;;  %v741_v39 = vld [vmem:[%s4176_s13 + $0x100] sm:$0xff]  ;;  %v726_v33 = vld [vmem:[%s4176_s13 + $0x88] sm:$0xff]  ;;  %s3750_s23 = scalar_lea.vmem %s3749_s29, 4096  ;;  %p3751_p8 = scmp.lt.s32.totalorder %s4557_s7, %s3749_s29 }
  0xfb   : > { %666 = vmatprep.subr.bf16.mxu1 %v3497_v12  ;;  %v749_v40 = vld [vmem:[%s4176_s13 + $0x140] sm:$0xff]  ;;  %v734_v34 = vld [vmem:[%s4176_s13 + $0xc8] sm:$0xff]  ;;  %p3752_p11 = scmp.lt.s32.totalorder %s3750_s23, %s3744_s20 }
  0xfc   : > { %3336 = vmatpush3.bf16.msra.mxu0 %v3482_v4  ;;  %v3073_v41 = vcombine.high %v741_v39, %v749_v40  ;;  %v3072_v42 = vcombine.low %v741_v39, %v749_v40  ;;  %v757_v43 = vld [vmem:[%s4176_s13 + $0x180] sm:$0xff]  ;;  %v3059_v39 = vcombine.high %v726_v33, %v734_v34  ;;  %v742_v40 = vld [vmem:[%s4176_s13 + $0x108] sm:$0xff]  ;;  %s4555_s1 = scalar_lea.hbm %s4676_s14, %s3319_s17  ;;  %p4677_p13 = scmp.ne.s32.totalorder %s4675_s22, 0 }
  0xfd   : > { %3337 = vmatprep.subr.bf16.mxu0 %v3853_v0  ;;  %v765_v44 = vld [vmem:[%s4176_s13 + $0x1c0] sm:$0xff]  ;;  %p3753_p1 = por %p3752_p11, %p3751_p8 }
  0xfe   : > { %667 = vmatpush1.bf16.msra.mxu1 %v3499_v14  ;;  %v3089_v45 = vcombine.high %v757_v43, %v765_v44  ;;  %v3088_v46 = vcombine.low %v757_v43, %v765_v44  ;;  %v773_v47 = vld [vmem:[%s4176_s13 + $0x200] sm:$0xff]  ;;  %v758_v44 = vld [vmem:[%s4176_s13 + $0x188] sm:$0xff]  ;;  %p3746_p12 = pnand %p3745_p6, %p4677_p13 }
  0xff   : > { %668 = vmatprep.subr.bf16.mxu1 %v3500_v15  ;;  %v781_v48 = vld [vmem:[%s4176_s13 + $0x240] sm:$0xff] }
 0x100   : > { %3338 = vmatpush3.bf16.msra.mxu0 %v3483_v10  ;;  %v3105_v49 = vcombine.high %v773_v47, %v781_v48  ;;  %v3104_v50 = vcombine.low %v773_v47, %v781_v48  ;;  %v789_v51 = vld [vmem:[%s4176_s13 + $0x280] sm:$0xff]  ;;  %v774_v48 = vld [vmem:[%s4176_s13 + $0x208] sm:$0xff]  ;;  %p3747_p7 = pneg %p3746_p12 }
 0x101   : > { %3339 = vmatprep.subr.bf16.mxu0 %v3853_v0  ;;  %v797_v52 = vld [vmem:[%s4176_s13 + $0x2c0] sm:$0xff] }
 0x102   : > { %669 = vmatpush1.bf16.msra.mxu1 %v3502_v17  ;;  %v3121_v53 = vcombine.high %v789_v51, %v797_v52  ;;  %v3120_v54 = vcombine.low %v789_v51, %v797_v52  ;;  %v805_v55 = vld [vmem:[%s4176_s13 + $0x300] sm:$0xff]  ;;  %p3754_p9 = pnand %p3753_p1, %p3747_p7 }
 0x103   : > { %670 = vmatprep.subr.bf16.mxu1 %v3503_v18  ;;  %v813_v56 = vld [vmem:[%s4176_s13 + $0x340] sm:$0xff] }
 0x104   : > { %3340 = vmatpush3.bf16.msra.mxu0 %v3484_v13  ;;  %v3137_v57 = vcombine.high %v805_v55, %v813_v56  ;;  %v3136_v58 = vcombine.low %v805_v55, %v813_v56  ;;  %v821_v59 = vld [vmem:[%s4176_s13 + $0x380] sm:$0xff] }
 0x105   : > { %3341 = vmatprep.subr.bf16.mxu0 %v3853_v0  ;;  %v829_v60 = vld [vmem:[%s4176_s13 + $0x3c0] sm:$0xff] }
 0x106   : > { %671 = vmatpush1.bf16.msra.mxu1 %v3505_v20  ;;  %v3153_v61 = vcombine.high %v821_v59, %v829_v60  ;;  %v3152_v62 = vcombine.low %v821_v59, %v829_v60  ;;  %v837_v63 = vld [vmem:[%s4176_s13 + $0x400] sm:$0xff] }
 0x107   : > { %672 = vmatprep.subr.bf16.mxu1 %v3506_v22  ;;  %v853_v3 = vld [vmem:[%s4176_s13 + $0x480] sm:$0xff] }
 0x108   : > { %3342 = vmatpush3.bf16.msra.mxu0 %v3485_v16  ;;  %v861_v4 = vld [vmem:[%s4176_s13 + $0x4c0] sm:$0xff] }
 0x109   : > { %3343 = vmatprep.subr.bf16.mxu0 %v3853_v0  ;;  %v845_v0 = vld [vmem:[%s4176_s13 + $0x440] sm:$0xff]  ;;  %v3185_v5 = vcombine.high %v853_v3, %v861_v4  ;;  %v3184_v6 = vcombine.low %v853_v3, %v861_v4 }
 0x10a   : > { %673 = vmatpush1.bf16.msra.mxu1 %v3508_v23  ;;  %v3169_v1 = vcombine.high %v837_v63, %v845_v0  ;;  %v3168_v2 = vcombine.low %v837_v63, %v845_v0  ;;  %v869_v7 = vld [vmem:[%s4176_s13 + $0x500] sm:$0xff]  ;;  %v3014_v23 = vld [vmem:[#allocation7] ss:$0 sm:$0xff] }
 0x10b   : > { %674 = vmatprep.subr.bf16.mxu1 %v3509_v24  ;;  %v877_v8 = vld [vmem:[%s4176_s13 + $0x540] sm:$0xff] }
 0x10c   : > { %3344 = vmatpush3.bf16.msra.mxu0 %v3486_v19  ;;  %v3201_v9 = vcombine.high %v869_v7, %v877_v8  ;;  %v3200_v10 = vcombine.low %v869_v7, %v877_v8  ;;  %v885_v11 = vld [vmem:[%s4176_s13 + $0x580] sm:$0xff] }
 0x10d   : > { %2329 = vmatprep.subr.bf16.mxu0 %v3041_v31  ;;  %v893_v12 = vld [vmem:[%s4176_s13 + $0x5c0] sm:$0xff] }
 0x10e   : > { %675 = vmatpush1.bf16.msra.mxu1 %v3511_v25  ;;  %v3217_v13 = vcombine.high %v885_v11, %v893_v12  ;;  %v3216_v14 = vcombine.low %v885_v11, %v893_v12  ;;  %v901_v15 = vld [vmem:[%s4176_s13 + $0x600] sm:$0xff] }
 0x10f   : > { %3346 = vmatmul.mubr.bf16.vlgmr.msra.gmra.mrb[0].mxu0 %v3487_v21  ;;  %2372 = vmatprep.subr.bf16.mxu1 %v3043_v36  ;;  %v909_v16 = vld [vmem:[%s4176_s13 + $0x640] sm:$0xff] }
 0x110   : > { %2330 = vmatpush1.bf16.msra.mxu0 %v3040_v30  ;;  %v3233_v17 = vcombine.high %v901_v15, %v909_v16  ;;  %v3232_v18 = vcombine.low %v901_v15, %v909_v16  ;;  %v917_v19 = vld [vmem:[%s4176_s13 + $0x680] sm:$0xff] }
 0x111   : > { %2331 = vmatprep.subr.bf16.mxu0 %v3057_v37  ;;  %v925_v20 = vld [vmem:[%s4176_s13 + $0x6c0] sm:$0xff] }
 0x112   : > { %v3249_v21 = vcombine.high %v917_v19, %v925_v20  ;;  %v3248_v22 = vcombine.low %v917_v19, %v925_v20 }
 0x114   : > { %2332 = vmatpush1.bf16.msra.mxu0 %v3056_v38 }
 0x115   : > { %2333 = vmatprep.subr.bf16.mxu0 %v3073_v41  ;;  %v750_v41 = vld [vmem:[%s4176_s13 + $0x148] sm:$0xff] }
 0x116   : > { %v3075_v43 = vcombine.high %v742_v40, %v750_v41 }
 0x118   : > { %2334 = vmatpush1.bf16.msra.mxu0 %v3072_v42  ;;  %v3058_v42 = vcombine.low %v726_v33, %v734_v34  ;;  %v949_v33 = vld [vmem:[%s4176_s13 + $0x780] sm:$0xff] }
 0x119   : > { %2335 = vmatprep.subr.bf16.mxu0 %v3089_v45  ;;  %v766_v45 = vld [vmem:[%s4176_s13 + $0x1c8] sm:$0xff]  ;;  %v957_v34 = vld [vmem:[%s4176_s13 + $0x7c0] sm:$0xff] }
 0x11a   : > { %v3091_v47 = vcombine.high %v758_v44, %v766_v45 }
 0x11c   : > { %2336 = vmatpush1.bf16.msra.mxu0 %v3088_v46  ;;  %v3074_v46 = vcombine.low %v742_v40, %v750_v41 }
 0x11d   : > { %2337 = vmatprep.subr.bf16.mxu0 %v3105_v49  ;;  %v782_v49 = vld [vmem:[%s4176_s13 + $0x248] sm:$0xff] }
 0x11e   : > { %v3107_v29 = vcombine.high %v774_v48, %v782_v49  ;;  %v3106_v51 = vcombine.low %v774_v48, %v782_v49 }
 0x120   : > { %2338 = vmatpush1.bf16.msra.mxu0 %v3104_v50  ;;  %v3090_v50 = vcombine.low %v758_v44, %v766_v45  ;;  %v712_v44 = vld [vmem:[%s4176_s13 + $0x18] sm:$0xff] }
 0x121   : > { %2339 = vmatprep.subr.bf16.mxu0 %v3121_v53  ;;  %v806_v53 = vld [vmem:[%s4176_s13 + $0x308] sm:$0xff] }
 0x124   : > { %2340 = vmatpush1.bf16.msra.mxu0 %v3120_v54  ;;  %v814_v54 = vld [vmem:[%s4176_s13 + $0x348] sm:$0xff] }
 0x125   : > { %2341 = vmatprep.subr.bf16.mxu0 %v3137_v57  ;;  %v3139_v56 = vcombine.high %v806_v53, %v814_v54  ;;  %v822_v57 = vld [vmem:[%s4176_s13 + $0x388] sm:$0xff]  ;;  %v3138_v59 = vcombine.low %v806_v53, %v814_v54 }
 0x128   : > { %2342 = vmatpush1.bf16.msra.mxu0 %v3136_v58  ;;  %v830_v58 = vld [vmem:[%s4176_s13 + $0x3c8] sm:$0xff] }
 0x129   : > { %2343 = vmatprep.subr.bf16.mxu0 %v3153_v61  ;;  %v3155_v60 = vcombine.high %v822_v57, %v830_v58  ;;  %v838_v61 = vld [vmem:[%s4176_s13 + $0x408] sm:$0xff]  ;;  %v3154_v63 = vcombine.low %v822_v57, %v830_v58 }
 0x12c   : > { %2344 = vmatpush1.bf16.msra.mxu0 %v3152_v62  ;;  %v846_v62 = vld [vmem:[%s4176_s13 + $0x448] sm:$0xff] }
 0x12d   : > { %2345 = vmatprep.subr.bf16.mxu0 %v3169_v1  ;;  %v3171_v0 = vcombine.high %v838_v61, %v846_v62  ;;  %v854_v1 = vld [vmem:[%s4176_s13 + $0x488] sm:$0xff]  ;;  %v3170_v3 = vcombine.low %v838_v61, %v846_v62 }
 0x130   : > { %2346 = vmatpush1.bf16.msra.mxu0 %v3168_v2  ;;  %v862_v2 = vld [vmem:[%s4176_s13 + $0x4c8] sm:$0xff] }
 0x131   : > { %2347 = vmatprep.subr.bf16.mxu0 %v3185_v5  ;;  %v3187_v4 = vcombine.high %v854_v1, %v862_v2  ;;  %v870_v5 = vld [vmem:[%s4176_s13 + $0x508] sm:$0xff]  ;;  %v3186_v7 = vcombine.low %v854_v1, %v862_v2  ;;  %v727_v2 = vld [vmem:[%s4176_s13 + $0x90] sm:$0xff] }
 0x134   : > { %2348 = vmatpush1.bf16.msra.mxu0 %v3184_v6  ;;  %v878_v6 = vld [vmem:[%s4176_s13 + $0x548] sm:$0xff] }
 0x135   : > { %2349 = vmatprep.subr.bf16.mxu0 %v3201_v9  ;;  %v3203_v8 = vcombine.high %v870_v5, %v878_v6  ;;  %v886_v9 = vld [vmem:[%s4176_s13 + $0x588] sm:$0xff]  ;;  %v3202_v11 = vcombine.low %v870_v5, %v878_v6  ;;  %v728_v5 = vld [vmem:[%s4176_s13 + $0x98] sm:$0xff] }
 0x136   : > { %v736_v6 = vld [vmem:[%s4176_s13 + $0xd8] sm:$0xff] }
 0x138   : > { %2350 = vmatpush1.bf16.msra.mxu0 %v3200_v10  ;;  %v894_v10 = vld [vmem:[%s4176_s13 + $0x5c8] sm:$0xff] }
 0x139   : > { %2351 = vmatprep.subr.bf16.mxu0 %v3217_v13  ;;  %v3219_v12 = vcombine.high %v886_v9, %v894_v10  ;;  %v902_v13 = vld [vmem:[%s4176_s13 + $0x608] sm:$0xff]  ;;  %v3218_v15 = vcombine.low %v886_v9, %v894_v10  ;;  %v3063_v10 = vcombine.high %v728_v5, %v736_v6 }
 0x13c   : > { %2352 = vmatpush1.bf16.msra.mxu0 %v3216_v14  ;;  %v910_v14 = vld [vmem:[%s4176_s13 + $0x648] sm:$0xff] }
 0x13d   : > { %2353 = vmatprep.subr.bf16.mxu0 %v3233_v17  ;;  %v3235_v16 = vcombine.high %v902_v13, %v910_v14  ;;  %v918_v17 = vld [vmem:[%s4176_s13 + $0x688] sm:$0xff]  ;;  %v3234_v19 = vcombine.low %v902_v13, %v910_v14  ;;  %v752_v13 = vld [vmem:[%s4176_s13 + $0x158] sm:$0xff] }
 0x140   : > { %2354 = vmatpush1.bf16.msra.mxu0 %v3232_v18  ;;  %v926_v18 = vld [vmem:[%s4176_s13 + $0x6c8] sm:$0xff] }
 0x141   : > { %2355 = vmatprep.subr.bf16.mxu0 %v3249_v21  ;;  %v3251_v20 = vcombine.high %v918_v17, %v926_v18  ;;  %v3250_v21 = vcombine.low %v918_v17, %v926_v18  ;;  %v759_v18 = vld [vmem:[%s4176_s13 + $0x190] sm:$0xff] }
 0x144   : > { %2356 = vmatpush1.bf16.msra.mxu0 %v3248_v22  ;;  %v933_v22 = vld [vmem:[%s4176_s13 + $0x700] sm:$0xff] }
 0x1e2   : > { %v542_v24 = vpop.f32.mrb[0].mxu0 }
 0x1e3   : > { %v543_v25 = vadd.f32 %v3014_v23, %v542_v24  ;;  %v3347_v27 = vpop.f32.mrb[1].mxu0  ;;  %v934_v24 = vld [vmem:[%s4176_s13 + $0x708] sm:$0xff] }
 0x1e4   : > { %v545_v28 = vpop.f32.mrb[2].mxu0  ;;  %v942_v27 = vld [vmem:[%s4176_s13 + $0x748] sm:$0xff] }
 0x1e5   : > { %v546_v30 = vadd.f32 %v3014_v23, %v545_v28  ;;  %v3348_v31 = vpop.f32.mrb[3].mxu0  ;;  %v549_v36 = vmax.f32 %v543_v25, 0.0  ;;  %v941_v23 = vld [vmem:[%s4176_s13 + $0x740] sm:$0xff] }
 0x1e6   : > { %v3265_v25 = vcombine.high %v933_v22, %v941_v23  ;;  %v3264_v28 = vcombine.low %v933_v22, %v941_v23  ;;  %v3267_v31 = vcombine.high %v934_v24, %v942_v27 }
 0x1e7   : > { %v550_v37 = vmax.f32 %v546_v30, 0.0  ;;  %v3266_v30 = vcombine.low %v934_v24, %v942_v27  ;;  %v775_v27 = vld [vmem:[%s4176_s13 + $0x210] sm:$0xff] }
 0x1e8   : > { %2357 = vmatprep.subr.bf16.mxu0 %v3265_v25 }
 0x1e9   : > { %v551_v38 = vpack.c.bf16 %v550_v37, %v549_v36  ;;  %2358 = vmatpush1.bf16.msra.mxu0 %v3264_v28  ;;  %v950_v36 = vld [vmem:[%s4176_s13 + $0x788] sm:$0xff]  ;;  %v3281_v37 = vcombine.high %v949_v33, %v957_v34  ;;  %v783_v28 = vld [vmem:[%s4176_s13 + $0x250] sm:$0xff] }
 0x1eb   : > { %693 = vmatmul.mubr.bf16.vlgmr.msra.gmra.mrb[0].mxu1 %v551_v38  ;;  %v958_v38 = vld [vmem:[%s4176_s13 + $0x7c8] sm:$0xff]  ;;  %2359 = vmatprep.subr.bf16.mxu0 %v3281_v37 }
 0x1ec   : > { %2373 = vmatpush1.bf16.msra.mxu1 %v3042_v35  ;;  %v798_v35 = vld [vmem:[%s4176_s13 + $0x2c8] sm:$0xff]  ;;  %v3282_v40 = vcombine.low %v950_v36, %v958_v38  ;;  %v3283_v41 = vcombine.high %v950_v36, %v958_v38  ;;  %v3109_v36 = vcombine.high %v775_v27, %v783_v28  ;;  %v791_v38 = vld [vmem:[%s4176_s13 + $0x290] sm:$0xff] }
 0x1ed   : > { %2374 = vmatprep.subr.bf16.mxu1 %v3059_v39  ;;  %v3123_v52 = vcombine.high %v790_v32, %v798_v35  ;;  %v3122_v55 = vcombine.low %v790_v32, %v798_v35  ;;  %v3280_v39 = vcombine.low %v949_v33, %v957_v34  ;;  %v568_v35 = vld [vmem:[#allocation10] sm:$0x3] }
 0x1ef   : > { %2360 = vmatpush1.bf16.msra.mxu0 %v3280_v39  ;;  %v799_v39 = vld [vmem:[%s4176_s13 + $0x2d0] sm:$0xff] }
 0x1f0   : > { %2375 = vmatpush1.bf16.msra.mxu1 %v3058_v42  ;;  %v711_v42 = vld [vmem:[%s4176_s13 + $0x10] sm:$0xff] }
 0x1f1   : > { %2376 = vmatprep.subr.bf16.mxu1 %v3075_v43  ;;  %v719_v43 = vld [vmem:[%s4176_s13 + $0x50] sm:$0xff] }
 0x1f2   : > { %v3045_v45 = vcombine.high %v711_v42, %v719_v43 }
 0x1f4   : > { %2377 = vmatpush1.bf16.msra.mxu1 %v3074_v46  ;;  %v720_v46 = vld [vmem:[%s4176_s13 + $0x58] sm:$0xff]  ;;  %2415 = vmatprep.subr.bf16.mxu0 %v3045_v45 }
 0x1f5   : > { %2378 = vmatprep.subr.bf16.mxu1 %v3091_v47  ;;  %v3044_v47 = vcombine.low %v711_v42, %v719_v43  ;;  %v3046_v48 = vcombine.low %v712_v44, %v720_v46  ;;  %v3047_v49 = vcombine.high %v712_v44, %v720_v46  ;;  %v3108_v42 = vcombine.low %v775_v27, %v783_v28  ;;  %v807_v46 = vld [vmem:[%s4176_s13 + $0x310] sm:$0xff]  ;;  %v888_v27 = vld [vmem:[%s4176_s13 + $0x598] sm:$0xff] }
 0x1f6   : > { %v3125_v44 = vcombine.high %v791_v38, %v799_v39  ;;  %v896_v28 = vld [vmem:[%s4176_s13 + $0x5d8] sm:$0xff] }
 0x1f8   : > { %2379 = vmatpush1.bf16.msra.mxu1 %v3090_v50  ;;  %v570_v50 = vlaneseq }
 0x1f9   : > { %2380 = vmatprep.subr.bf16.mxu1 %v3107_v29 }
 0x1fa   : > { %v4262_v29 = vshrl.u32 %v570_v50, 7  ;;  %v3124_v50 = vcombine.low %v791_v38, %v799_v39  ;;  %v904_v38 = vld [vmem:[%s4176_s13 + $0x618] sm:$0xff] }
 0x1fb   : > { %v912_v39 = vld [vmem:[%s4176_s13 + $0x658] sm:$0xff] }
 0x1fc   : > { %2381 = vmatpush1.bf16.msra.mxu1 %v3106_v51  ;;  %v4265_v32 = vsub.s32 0, %v4262_v29  ;;  %v4268_v51 = vsub.s32 1, %v4262_v29 }
 0x1fd   : > { %2382 = vmatprep.subr.bf16.mxu1 %v3123_v52 }
 0x1fe   : > { %v573_v52 = vrot.slane %v568_v35, %v4265_v32  ;;  %v577_v53 = vrot.slane %v568_v35, %v4268_v51 }
 0x200   : > { %2383 = vmatpush1.bf16.msra.mxu1 %v3122_v55 }
 0x201   : > { %2384 = vmatprep.subr.bf16.mxu1 %v3139_v56 }
 0x204   : > { %2385 = vmatpush1.bf16.msra.mxu1 %v3138_v59 }
 0x205   : > { %2386 = vmatprep.subr.bf16.mxu1 %v3155_v60 }
 0x208   : > { %2387 = vmatpush1.bf16.msra.mxu1 %v3154_v63 }
 0x209   : > { %2388 = vmatprep.subr.bf16.mxu1 %v3171_v0 }
 0x20c   : > { %2389 = vmatpush1.bf16.msra.mxu1 %v3170_v3 }
 0x20d   : > { %2390 = vmatprep.subr.bf16.mxu1 %v3187_v4  ;;  %v735_v4 = vld [vmem:[%s4176_s13 + $0xd0] sm:$0xff] }
 0x20e   : > { %v3061_v9 = vcombine.high %v727_v2, %v735_v4  ;;  %v3060_v14 = vcombine.low %v727_v2, %v735_v4 }
 0x210   : > { %2391 = vmatpush1.bf16.msra.mxu1 %v3186_v7 }
 0x211   : > { %2392 = vmatprep.subr.bf16.mxu1 %v3203_v8  ;;  %v743_v8 = vld [vmem:[%s4176_s13 + $0x110] sm:$0xff] }
 0x214   : > { %2393 = vmatpush1.bf16.msra.mxu1 %v3202_v11  ;;  %v751_v11 = vld [vmem:[%s4176_s13 + $0x150] sm:$0xff] }
 0x215   : > { %2394 = vmatprep.subr.bf16.mxu1 %v3219_v12  ;;  %v744_v12 = vld [vmem:[%s4176_s13 + $0x118] sm:$0xff]  ;;  %v3076_v22 = vcombine.low %v743_v8, %v751_v11 }
 0x216   : > { %v3079_v17 = vcombine.high %v744_v12, %v752_v13  ;;  %v3078_v23 = vcombine.low %v744_v12, %v752_v13 }
 0x218   : > { %2395 = vmatpush1.bf16.msra.mxu1 %v3218_v15  ;;  %v3062_v15 = vcombine.low %v728_v5, %v736_v6 }
 0x219   : > { %2396 = vmatprep.subr.bf16.mxu1 %v3235_v16  ;;  %v3077_v16 = vcombine.high %v743_v8, %v751_v11  ;;  %v855_v8 = vld [vmem:[%s4176_s13 + $0x490] sm:$0xff]  ;;  %v864_v11 = vld [vmem:[%s4176_s13 + $0x4d8] sm:$0xff] }
 0x21c   : > { %2397 = vmatpush1.bf16.msra.mxu1 %v3234_v19  ;;  %v767_v19 = vld [vmem:[%s4176_s13 + $0x1d0] sm:$0xff] }
 0x21d   : > { %2398 = vmatprep.subr.bf16.mxu1 %v3251_v20  ;;  %v760_v20 = vld [vmem:[%s4176_s13 + $0x198] sm:$0xff]  ;;  %v3093_v24 = vcombine.high %v759_v18, %v767_v19  ;;  %v3092_v33 = vcombine.low %v759_v18, %v767_v19 }
 0x21e   : > { %v872_v18 = vld [vmem:[%s4176_s13 + $0x518] sm:$0xff] }
 0x21f   : > { %v880_v19 = vld [vmem:[%s4176_s13 + $0x558] sm:$0xff] }
 0x220   : > { %2399 = vmatpush1.bf16.msra.mxu1 %v3250_v21  ;;  %v768_v21 = vld [vmem:[%s4176_s13 + $0x1d8] sm:$0xff] }
 0x221   : > { %2400 = vmatprep.subr.bf16.mxu1 %v3267_v31  ;;  %v3095_v25 = vcombine.high %v760_v20, %v768_v21  ;;  %v784_v31 = vld [vmem:[%s4176_s13 + $0x258] sm:$0xff]  ;;  %v3094_v34 = vcombine.low %v760_v20, %v768_v21 }
 0x224   : > { %2401 = vmatpush1.bf16.msra.mxu1 %v3266_v30  ;;  %v776_v30 = vld [vmem:[%s4176_s13 + $0x218] sm:$0xff] }
 0x225   : > { %2402 = vmatprep.subr.bf16.mxu1 %v3283_v41  ;;  %v3111_v37 = vcombine.high %v776_v30, %v784_v31  ;;  %v800_v41 = vld [vmem:[%s4176_s13 + $0x2d8] sm:$0xff]  ;;  %v3110_v43 = vcombine.low %v776_v30, %v784_v31  ;;  %v3206_v31 = vcombine.low %v872_v18, %v880_v19 }
 0x228   : > { %2403 = vmatpush1.bf16.msra.mxu1 %v3282_v40  ;;  %v792_v40 = vld [vmem:[%s4176_s13 + $0x298] sm:$0xff] }
 0x229   : > { %2458 = vmatprep.subr.bf16.mxu1 %v3047_v49  ;;  %v3127_v45 = vcombine.high %v792_v40, %v800_v41  ;;  %v816_v49 = vld [vmem:[%s4176_s13 + $0x358] sm:$0xff]  ;;  %v3126_v35 = vcombine.low %v792_v40, %v800_v41  ;;  %v3222_v41 = vcombine.low %v888_v27, %v896_v28 }
 0x2be   : > { %v694_v54 = vpop.f32.mrb[0].mxu1 }
 0x2bf   : > { %v695_v55 = vadd.f32 %v694_v54, %v573_v52  ;;  %v696_v56 = vpop.f32.mrb[1].mxu1  ;;  %v823_v54 = vld [vmem:[%s4176_s13 + $0x390] sm:$0xff] }
 0x2c0   : > { %v697_v57 = vadd.f32 %v696_v56, %v577_v53  ;;  %v698_v58 = vpop.f32.mrb[2].mxu1  ;;  %v824_v56 = vld [vmem:[%s4176_s13 + $0x398] sm:$0xff] }
 0x2c1   : > { %v699_v59 = vadd.f32 %v698_v58, %v573_v52  ;;  %v700_v60 = vpop.f32.mrb[3].mxu1  ;;  %v703_v62 = vmax.f32 %v695_v55, 0.0  ;;  %v831_v55 = vld [vmem:[%s4176_s13 + $0x3d0] sm:$0xff] }
 0x2c2   : > { %v701_v61 = vadd.f32 %v700_v60, %v577_v53  ;;  %v704_v0 = vmax.f32 %v697_v57, 0.0  ;;  %v832_v57 = vld [vmem:[%s4176_s13 + $0x3d8] sm:$0xff]  ;;  %v3157_v60 = vcombine.high %v823_v54, %v831_v55  ;;  %v3156_v2 = vcombine.low %v823_v54, %v831_v55 }
 0x2c3   : > { %v705_v63 = vmax.f32 %v699_v59, 0.0  ;;  %v3158_v4 = vcombine.low %v824_v56, %v832_v57  ;;  %v936_v54 = vld [vmem:[%s4176_s13 + $0x718] sm:$0xff] }
 0x2c4   : > { %v706_v1 = vmax.f32 %v701_v61, 0.0  ;;  %v3159_v61 = vcombine.high %v824_v56, %v832_v57  ;;  %v944_v55 = vld [vmem:[%s4176_s13 + $0x758] sm:$0xff] }
 0x2c5   : > { %v4273_v3 = vpack.c.bf16 %v705_v63, %v703_v62  ;;  %v839_v62 = vld [vmem:[%s4176_s13 + $0x410] sm:$0xff] }
 0x2c6   : > { %v4278_v7 = vpack.c.bf16 %v706_v1, %v704_v0  ;;  %v847_v63 = vld [vmem:[%s4176_s13 + $0x450] sm:$0xff]  ;;  %v840_v0 = vld [vmem:[%s4176_s13 + $0x418] sm:$0xff] }
 0x2c7   : > { %v848_v1 = vld [vmem:[%s4176_s13 + $0x458] sm:$0xff]  ;;  %v3173_v5 = vcombine.high %v839_v62, %v847_v63  ;;  %v3172_v12 = vcombine.low %v839_v62, %v847_v63 }
 0x2c8   : > { %2361 = vmatprep.mubr.bf16.mxu0 %v4278_v7  ;;  %2404 = vmatprep.mubr.bf16.mxu1 %v4278_v7  ;;  %v3175_v6 = vcombine.high %v840_v0, %v848_v1  ;;  %v3174_v13 = vcombine.low %v840_v0, %v848_v1  ;;  %v952_v62 = vld [vmem:[%s4176_s13 + $0x798] sm:$0xff]  ;;  %v3270_v1 = vcombine.low %v936_v54, %v944_v55 }
 0x2c9   : > { %2362 = vmatmul.mubr.bf16.vlgmr.msra.gmra.mrb[4].mxu0 %v4273_v3  ;;  %2405 = vmatmul.mubr.bf16.vlgmr.msra.gmra.mrb[4].mxu1 %v4273_v3  ;;  %v960_v63 = vld [vmem:[%s4176_s13 + $0x7d8] sm:$0xff] }
 0x2ca   : > { %2416 = vmatpush1.bf16.msra.mxu0 %v3044_v47  ;;  %2459 = vmatpush1.bf16.msra.mxu1 %v3046_v48  ;;  %v815_v47 = vld [vmem:[%s4176_s13 + $0x350] sm:$0xff]  ;;  %v808_v48 = vld [vmem:[%s4176_s13 + $0x318] sm:$0xff] }
 0x2cb   : > { %2447 = vmatprep.mubr.bf16.mxu0 %v4278_v7  ;;  %2490 = vmatprep.mubr.bf16.mxu1 %v4278_v7  ;;  %v3141_v52 = vcombine.high %v807_v46, %v815_v47  ;;  %v3143_v53 = vcombine.high %v808_v48, %v816_v49  ;;  %v3140_v58 = vcombine.low %v807_v46, %v815_v47  ;;  %v920_v46 = vld [vmem:[%s4176_s13 + $0x698] sm:$0xff] }
 0x2cc   : > { %2417 = vmatprep.subr.bf16.mxu0 %v3061_v9  ;;  %2460 = vmatprep.subr.bf16.mxu1 %v3063_v10  ;;  %v3142_v59 = vcombine.low %v808_v48, %v816_v49  ;;  %v863_v9 = vld [vmem:[%s4176_s13 + $0x4d0] sm:$0xff]  ;;  %v856_v10 = vld [vmem:[%s4176_s13 + $0x498] sm:$0xff]  ;;  %v3238_v49 = vcombine.low %v904_v38, %v912_v39 }
 0x2cd   : > { %v3188_v20 = vcombine.low %v855_v8, %v863_v9  ;;  %v3190_v21 = vcombine.low %v856_v10, %v864_v11  ;;  %v928_v47 = vld [vmem:[%s4176_s13 + $0x6d8] sm:$0xff] }
 0x2ce   : > { %2418 = vmatpush1.bf16.msra.mxu0 %v3060_v14  ;;  %2461 = vmatpush1.bf16.msra.mxu1 %v3062_v15  ;;  %v3189_v14 = vcombine.high %v855_v8, %v863_v9  ;;  %v3191_v15 = vcombine.high %v856_v10, %v864_v11  ;;  %v3254_v57 = vcombine.low %v920_v46, %v928_v47  ;;  %v714_v8 = vld [vmem:[%s4176_s13 + $0x28] sm:$0xff] }
 0x2cf   : > { %2419 = vmatprep.subr.bf16.mxu0 %v3077_v16  ;;  %2462 = vmatprep.subr.bf16.mxu1 %v3079_v17  ;;  %v871_v16 = vld [vmem:[%s4176_s13 + $0x510] sm:$0xff]  ;;  %v722_v9 = vld [vmem:[%s4176_s13 + $0x68] sm:$0xff]  ;;  %v3286_v11 = vcombine.low %v952_v62, %v960_v63 }
 0x2d0   : > { %v879_v17 = vld [vmem:[%s4176_s13 + $0x550] sm:$0xff] }
 0x2d1   : > { %v3204_v30 = vcombine.low %v871_v16, %v879_v17 }
 0x2d2   : > { %2420 = vmatpush1.bf16.msra.mxu0 %v3076_v22  ;;  %2463 = vmatpush1.bf16.msra.mxu1 %v3078_v23  ;;  %v3205_v22 = vcombine.high %v871_v16, %v879_v17  ;;  %v3207_v23 = vcombine.high %v872_v18, %v880_v19  ;;  %v730_v16 = vld [vmem:[%s4176_s13 + $0xa8] sm:$0xff]  ;;  %v3050_v19 = vcombine.low %v714_v8, %v722_v9 }
 0x2d3   : > { %2421 = vmatprep.subr.bf16.mxu0 %v3093_v24  ;;  %2464 = vmatprep.subr.bf16.mxu1 %v3095_v25  ;;  %v887_v24 = vld [vmem:[%s4176_s13 + $0x590] sm:$0xff]  ;;  %v738_v17 = vld [vmem:[%s4176_s13 + $0xe8] sm:$0xff] }
 0x2d4   : > { %v895_v25 = vld [vmem:[%s4176_s13 + $0x5d0] sm:$0xff] }
 0x2d5   : > { %v3220_v40 = vcombine.low %v887_v24, %v895_v25 }
 0x2d6   : > { %2422 = vmatpush1.bf16.msra.mxu0 %v3092_v33  ;;  %2465 = vmatpush1.bf16.msra.mxu1 %v3094_v34  ;;  %v3221_v33 = vcombine.high %v887_v24, %v895_v25  ;;  %v3223_v34 = vcombine.high %v888_v27, %v896_v28  ;;  %v746_v24 = vld [vmem:[%s4176_s13 + $0x128] sm:$0xff]  ;;  %v3066_v28 = vcombine.low %v730_v16, %v738_v17 }
 0x2d7   : > { %2423 = vmatprep.subr.bf16.mxu0 %v3109_v36  ;;  %2466 = vmatprep.subr.bf16.mxu1 %v3111_v37  ;;  %v903_v36 = vld [vmem:[%s4176_s13 + $0x610] sm:$0xff]  ;;  %v754_v25 = vld [vmem:[%s4176_s13 + $0x168] sm:$0xff] }
 0x2d8   : > { %v911_v37 = vld [vmem:[%s4176_s13 + $0x650] sm:$0xff] }
 0x2d9   : > { %v3236_v48 = vcombine.low %v903_v36, %v911_v37 }
 0x2da   : > { %2424 = vmatpush1.bf16.msra.mxu0 %v3108_v42  ;;  %2467 = vmatpush1.bf16.msra.mxu1 %v3110_v43  ;;  %v3237_v42 = vcombine.high %v903_v36, %v911_v37  ;;  %v3239_v43 = vcombine.high %v904_v38, %v912_v39  ;;  %v762_v36 = vld [vmem:[%s4176_s13 + $0x1a8] sm:$0xff]  ;;  %v3082_v39 = vcombine.low %v746_v24, %v754_v25 }
 0x2db   : > { %2425 = vmatprep.subr.bf16.mxu0 %v3125_v44  ;;  %2468 = vmatprep.subr.bf16.mxu1 %v3127_v45  ;;  %v919_v44 = vld [vmem:[%s4176_s13 + $0x690] sm:$0xff]  ;;  %v770_v37 = vld [vmem:[%s4176_s13 + $0x1e8] sm:$0xff] }
 0x2dc   : > { %v927_v45 = vld [vmem:[%s4176_s13 + $0x6d0] sm:$0xff] }
 0x2dd   : > { %v3252_v56 = vcombine.low %v919_v44, %v927_v45 }
 0x2de   : > { %2426 = vmatpush1.bf16.msra.mxu0 %v3124_v50  ;;  %2469 = vmatpush1.bf16.msra.mxu1 %v3126_v35  ;;  %v3253_v50 = vcombine.high %v919_v44, %v927_v45  ;;  %v3255_v35 = vcombine.high %v920_v46, %v928_v47  ;;  %v778_v44 = vld [vmem:[%s4176_s13 + $0x228] sm:$0xff]  ;;  %v3098_v47 = vcombine.low %v762_v36, %v770_v37 }
 0x2df   : > { %2427 = vmatprep.subr.bf16.mxu0 %v3141_v52  ;;  %2470 = vmatprep.subr.bf16.mxu1 %v3143_v53  ;;  %v935_v52 = vld [vmem:[%s4176_s13 + $0x710] sm:$0xff]  ;;  %v786_v45 = vld [vmem:[%s4176_s13 + $0x268] sm:$0xff] }
 0x2e0   : > { %v943_v53 = vld [vmem:[%s4176_s13 + $0x750] sm:$0xff] }
 0x2e1   : > { %v3268_v0 = vcombine.low %v935_v52, %v943_v53 }
 0x2e2   : > { %2428 = vmatpush1.bf16.msra.mxu0 %v3140_v58  ;;  %2471 = vmatpush1.bf16.msra.mxu1 %v3142_v59  ;;  %v3269_v58 = vcombine.high %v935_v52, %v943_v53  ;;  %v3271_v59 = vcombine.high %v936_v54, %v944_v55  ;;  %v794_v52 = vld [vmem:[%s4176_s13 + $0x2a8] sm:$0xff]  ;;  %v3114_v55 = vcombine.low %v778_v44, %v786_v45 }
 0x2e3   : > { %2429 = vmatprep.subr.bf16.mxu0 %v3157_v60  ;;  %2472 = vmatprep.subr.bf16.mxu1 %v3159_v61  ;;  %v951_v60 = vld [vmem:[%s4176_s13 + $0x790] sm:$0xff]  ;;  %v802_v53 = vld [vmem:[%s4176_s13 + $0x2e8] sm:$0xff] }
 0x2e4   : > { %v959_v61 = vld [vmem:[%s4176_s13 + $0x7d0] sm:$0xff] }
 0x2e5   : > { %v3284_v10 = vcombine.low %v951_v60, %v959_v61 }
 0x2e6   : > { %2430 = vmatpush1.bf16.msra.mxu0 %v3156_v2  ;;  %2473 = vmatpush1.bf16.msra.mxu1 %v3158_v4  ;;  %v3285_v2 = vcombine.high %v951_v60, %v959_v61  ;;  %v3287_v4 = vcombine.high %v952_v62, %v960_v63  ;;  %v810_v60 = vld [vmem:[%s4176_s13 + $0x328] sm:$0xff]  ;;  %v3130_v63 = vcombine.low %v794_v52, %v802_v53 }
 0x2e7   : > { %2431 = vmatprep.subr.bf16.mxu0 %v3173_v5  ;;  %2474 = vmatprep.subr.bf16.mxu1 %v3175_v6  ;;  %v713_v5 = vld [vmem:[%s4176_s13 + $0x20] sm:$0xff]  ;;  %v818_v61 = vld [vmem:[%s4176_s13 + $0x368] sm:$0xff] }
 0x2e8   : > { %v721_v6 = vld [vmem:[%s4176_s13 + $0x60] sm:$0xff] }
 0x2e9   : > { %v3048_v18 = vcombine.low %v713_v5, %v721_v6 }
 0x2ea   : > { %2432 = vmatpush1.bf16.msra.mxu0 %v3172_v12  ;;  %2475 = vmatpush1.bf16.msra.mxu1 %v3174_v13  ;;  %v3049_v12 = vcombine.high %v713_v5, %v721_v6  ;;  %v3051_v13 = vcombine.high %v714_v8, %v722_v9  ;;  %v826_v5 = vld [vmem:[%s4176_s13 + $0x3a8] sm:$0xff]  ;;  %v3146_v9 = vcombine.low %v810_v60, %v818_v61 }
 0x2eb   : > { %2433 = vmatprep.subr.bf16.mxu0 %v3189_v14  ;;  %2476 = vmatprep.subr.bf16.mxu1 %v3191_v15  ;;  %v729_v14 = vld [vmem:[%s4176_s13 + $0xa0] sm:$0xff]  ;;  %v834_v6 = vld [vmem:[%s4176_s13 + $0x3e8] sm:$0xff] }
 0x2ec   : > { %v737_v15 = vld [vmem:[%s4176_s13 + $0xe0] sm:$0xff] }
 0x2ed   : > { %v3064_v27 = vcombine.low %v729_v14, %v737_v15 }
 0x2ee   : > { %2434 = vmatpush1.bf16.msra.mxu0 %v3188_v20  ;;  %2477 = vmatpush1.bf16.msra.mxu1 %v3190_v21  ;;  %v3065_v20 = vcombine.high %v729_v14, %v737_v15  ;;  %v3067_v21 = vcombine.high %v730_v16, %v738_v17  ;;  %v842_v14 = vld [vmem:[%s4176_s13 + $0x428] sm:$0xff]  ;;  %v3162_v17 = vcombine.low %v826_v5, %v834_v6 }
 0x2ef   : > { %2435 = vmatprep.subr.bf16.mxu0 %v3205_v22  ;;  %2478 = vmatprep.subr.bf16.mxu1 %v3207_v23  ;;  %v745_v22 = vld [vmem:[%s4176_s13 + $0x120] sm:$0xff]  ;;  %v850_v15 = vld [vmem:[%s4176_s13 + $0x468] sm:$0xff] }
 0x2f0   : > { %v753_v23 = vld [vmem:[%s4176_s13 + $0x160] sm:$0xff] }
 0x2f1   : > { %v3080_v38 = vcombine.low %v745_v22, %v753_v23 }
 0x2f2   : > { %2436 = vmatpush1.bf16.msra.mxu0 %v3204_v30  ;;  %2479 = vmatpush1.bf16.msra.mxu1 %v3206_v31  ;;  %v3081_v30 = vcombine.high %v745_v22, %v753_v23  ;;  %v3083_v31 = vcombine.high %v746_v24, %v754_v25  ;;  %v858_v22 = vld [vmem:[%s4176_s13 + $0x4a8] sm:$0xff]  ;;  %v3178_v25 = vcombine.low %v842_v14, %v850_v15 }
 0x2f3   : > { %2437 = vmatprep.subr.bf16.mxu0 %v3221_v33  ;;  %2480 = vmatprep.subr.bf16.mxu1 %v3223_v34  ;;  %v761_v33 = vld [vmem:[%s4176_s13 + $0x1a0] sm:$0xff]  ;;  %v866_v23 = vld [vmem:[%s4176_s13 + $0x4e8] sm:$0xff] }
 0x2f4   : > { %v769_v34 = vld [vmem:[%s4176_s13 + $0x1e0] sm:$0xff] }
 0x2f5   : > { %v3096_v46 = vcombine.low %v761_v33, %v769_v34 }
 0x2f6   : > { %2438 = vmatpush1.bf16.msra.mxu0 %v3220_v40  ;;  %2481 = vmatpush1.bf16.msra.mxu1 %v3222_v41  ;;  %v3097_v40 = vcombine.high %v761_v33, %v769_v34  ;;  %v3099_v41 = vcombine.high %v762_v36, %v770_v37  ;;  %v874_v33 = vld [vmem:[%s4176_s13 + $0x528] sm:$0xff]  ;;  %v3194_v37 = vcombine.low %v858_v22, %v866_v23 }
 0x2f7   : > { %2439 = vmatprep.subr.bf16.mxu0 %v3237_v42  ;;  %2482 = vmatprep.subr.bf16.mxu1 %v3239_v43  ;;  %v777_v42 = vld [vmem:[%s4176_s13 + $0x220] sm:$0xff]  ;;  %v882_v34 = vld [vmem:[%s4176_s13 + $0x568] sm:$0xff] }
 0x2f8   : > { %v785_v43 = vld [vmem:[%s4176_s13 + $0x260] sm:$0xff] }
 0x2f9   : > { %v3112_v54 = vcombine.low %v777_v42, %v785_v43 }
 0x2fa   : > { %2440 = vmatpush1.bf16.msra.mxu0 %v3236_v48  ;;  %2483 = vmatpush1.bf16.msra.mxu1 %v3238_v49  ;;  %v3113_v48 = vcombine.high %v777_v42, %v785_v43  ;;  %v3115_v49 = vcombine.high %v778_v44, %v786_v45  ;;  %v890_v42 = vld [vmem:[%s4176_s13 + $0x5a8] sm:$0xff]  ;;  %v3210_v45 = vcombine.low %v874_v33, %v882_v34 }
 0x2fb   : > { %2441 = vmatprep.subr.bf16.mxu0 %v3253_v50  ;;  %2484 = vmatprep.subr.bf16.mxu1 %v3255_v35  ;;  %v793_v50 = vld [vmem:[%s4176_s13 + $0x2a0] sm:$0xff]  ;;  %v898_v43 = vld [vmem:[%s4176_s13 + $0x5e8] sm:$0xff] }
 0x2fc   : > { %v801_v35 = vld [vmem:[%s4176_s13 + $0x2e0] sm:$0xff] }
 0x2fd   : > { %v3128_v62 = vcombine.low %v793_v50, %v801_v35 }
 0x2fe   : > { %2442 = vmatpush1.bf16.msra.mxu0 %v3252_v56  ;;  %2485 = vmatpush1.bf16.msra.mxu1 %v3254_v57  ;;  %v3129_v56 = vcombine.high %v793_v50, %v801_v35  ;;  %v3131_v57 = vcombine.high %v794_v52, %v802_v53  ;;  %v906_v50 = vld [vmem:[%s4176_s13 + $0x628] sm:$0xff]  ;;  %v3226_v53 = vcombine.low %v890_v42, %v898_v43 }
 0x2ff   : > { %2443 = vmatprep.subr.bf16.mxu0 %v3269_v58  ;;  %2486 = vmatprep.subr.bf16.mxu1 %v3271_v59  ;;  %v809_v58 = vld [vmem:[%s4176_s13 + $0x320] sm:$0xff]  ;;  %v914_v35 = vld [vmem:[%s4176_s13 + $0x668] sm:$0xff] }
 0x300   : > { %v817_v59 = vld [vmem:[%s4176_s13 + $0x360] sm:$0xff] }
 0x301   : > { %v3144_v8 = vcombine.low %v809_v58, %v817_v59 }
 0x302   : > { %2444 = vmatpush1.bf16.msra.mxu0 %v3268_v0  ;;  %2487 = vmatpush1.bf16.msra.mxu1 %v3270_v1  ;;  %v3145_v0 = vcombine.high %v809_v58, %v817_v59  ;;  %v3147_v1 = vcombine.high %v810_v60, %v818_v61  ;;  %v922_v58 = vld [vmem:[%s4176_s13 + $0x6a8] sm:$0xff]  ;;  %v3242_v61 = vcombine.low %v906_v50, %v914_v35 }
 0x303   : > { %2445 = vmatprep.subr.bf16.mxu0 %v3285_v2  ;;  %2488 = vmatprep.subr.bf16.mxu1 %v3287_v4  ;;  %v825_v2 = vld [vmem:[%s4176_s13 + $0x3a0] sm:$0xff]  ;;  %v930_v59 = vld [vmem:[%s4176_s13 + $0x6e8] sm:$0xff] }
 0x304   : > { %v833_v4 = vld [vmem:[%s4176_s13 + $0x3e0] sm:$0xff] }
 0x305   : > { %v3160_v16 = vcombine.low %v825_v2, %v833_v4 }
 0x306   : > { %2446 = vmatpush1.bf16.msra.mxu0 %v3284_v10  ;;  %2489 = vmatpush1.bf16.msra.mxu1 %v3286_v11  ;;  %v3161_v10 = vcombine.high %v825_v2, %v833_v4  ;;  %v3163_v11 = vcombine.high %v826_v5, %v834_v6  ;;  %v938_v2 = vld [vmem:[%s4176_s13 + $0x728] sm:$0xff]  ;;  %v3258_v6 = vcombine.low %v922_v58, %v930_v59 }
 0x307   : > { %2501 = vmatprep.subr.bf16.mxu0 %v3049_v12  ;;  %2544 = vmatprep.subr.bf16.mxu1 %v3051_v13  ;;  %v841_v12 = vld [vmem:[%s4176_s13 + $0x420] sm:$0xff]  ;;  %v946_v4 = vld [vmem:[%s4176_s13 + $0x768] sm:$0xff] }
 0x308   : > { %v849_v13 = vld [vmem:[%s4176_s13 + $0x460] sm:$0xff] }
 0x309   : > { %2448 = vmatmul.mubr.bf16.vlgmr.msra.gmra.mrb[8].mxu0 %v4273_v3  ;;  %2491 = vmatmul.mubr.bf16.vlgmr.msra.gmra.mrb[8].mxu1 %v4273_v3  ;;  %v3176_v24 = vcombine.low %v841_v12, %v849_v13 }
 0x30a   : > { %2502 = vmatpush1.bf16.msra.mxu0 %v3048_v18  ;;  %2533 = vmatprep.mubr.bf16.mxu0 %v4278_v7  ;;  %v3177_v18 = vcombine.high %v841_v12, %v849_v13  ;;  %v954_v12 = vld [vmem:[%s4176_s13 + $0x7a8] sm:$0xff] }
 0x30b   : > { %2545 = vmatpush1.bf16.msra.mxu1 %v3050_v19  ;;  %2576 = vmatprep.mubr.bf16.mxu1 %v4278_v7  ;;  %v3179_v19 = vcombine.high %v842_v14, %v850_v15  ;;  %v962_v13 = vld [vmem:[%s4176_s13 + $0x7e8] sm:$0xff]  ;;  %v3274_v15 = vcombine.low %v938_v2, %v946_v4 }
 0x30c   : > { %2503 = vmatprep.subr.bf16.mxu0 %v3065_v20  ;;  %2546 = vmatprep.subr.bf16.mxu1 %v3067_v21  ;;  %v857_v20 = vld [vmem:[%s4176_s13 + $0x4a0] sm:$0xff] }
 0x30d   : > { %v865_v21 = vld [vmem:[%s4176_s13 + $0x4e0] sm:$0xff] }
 0x30e   : > { %2504 = vmatpush1.bf16.msra.mxu0 %v3064_v27  ;;  %v3193_v27 = vcombine.high %v857_v20, %v865_v21  ;;  %v3192_v36 = vcombine.low %v857_v20, %v865_v21  ;;  %v716_v20 = vld [vmem:[%s4176_s13 + $0x38] sm:$0xff] }
 0x30f   : > { %2547 = vmatpush1.bf16.msra.mxu1 %v3066_v28  ;;  %2505 = vmatprep.subr.bf16.mxu0 %v3081_v30  ;;  %v3195_v28 = vcombine.high %v858_v22, %v866_v23  ;;  %v873_v30 = vld [vmem:[%s4176_s13 + $0x520] sm:$0xff]  ;;  %v724_v21 = vld [vmem:[%s4176_s13 + $0x78] sm:$0xff]  ;;  %v3290_v23 = vcombine.low %v954_v12, %v962_v13 }
 0x310   : > { %2548 = vmatprep.subr.bf16.mxu1 %v3083_v31  ;;  %v881_v31 = vld [vmem:[%s4176_s13 + $0x560] sm:$0xff] }
 0x311   : > { %v3208_v44 = vcombine.low %v873_v30, %v881_v31 }
 0x312   : > { %2506 = vmatpush1.bf16.msra.mxu0 %v3080_v38  ;;  %v3209_v38 = vcombine.high %v873_v30, %v881_v31  ;;  %v732_v31 = vld [vmem:[%s4176_s13 + $0xb8] sm:$0xff] }
 0x313   : > { %2549 = vmatpush1.bf16.msra.mxu1 %v3082_v39  ;;  %2507 = vmatprep.subr.bf16.mxu0 %v3097_v40  ;;  %v3211_v39 = vcombine.high %v874_v33, %v882_v34  ;;  %v889_v40 = vld [vmem:[%s4176_s13 + $0x5a0] sm:$0xff]  ;;  %v740_v33 = vld [vmem:[%s4176_s13 + $0xf8] sm:$0xff]  ;;  %v3054_v34 = vcombine.low %v716_v20, %v724_v21 }
 0x314   : > { %2550 = vmatprep.subr.bf16.mxu1 %v3099_v41  ;;  %v897_v41 = vld [vmem:[%s4176_s13 + $0x5e0] sm:$0xff] }
 0x315   : > { %v3224_v52 = vcombine.low %v889_v40, %v897_v41 }
 0x316   : > { %2508 = vmatpush1.bf16.msra.mxu0 %v3096_v46  ;;  %v3225_v46 = vcombine.high %v889_v40, %v897_v41  ;;  %v748_v40 = vld [vmem:[%s4176_s13 + $0x138] sm:$0xff] }
 0x317   : > { %2551 = vmatpush1.bf16.msra.mxu1 %v3098_v47  ;;  %2509 = vmatprep.subr.bf16.mxu0 %v3113_v48  ;;  %v3227_v47 = vcombine.high %v890_v42, %v898_v43  ;;  %v905_v48 = vld [vmem:[%s4176_s13 + $0x620] sm:$0xff]  ;;  %v756_v41 = vld [vmem:[%s4176_s13 + $0x178] sm:$0xff]  ;;  %v3070_v43 = vcombine.low %v732_v31, %v740_v33 }
 0x318   : > { %2552 = vmatprep.subr.bf16.mxu1 %v3115_v49  ;;  %v913_v49 = vld [vmem:[%s4176_s13 + $0x660] sm:$0xff] }
 0x319   : > { %v3240_v60 = vcombine.low %v905_v48, %v913_v49 }
 0x31a   : > { %2510 = vmatpush1.bf16.msra.mxu0 %v3112_v54  ;;  %v3241_v54 = vcombine.high %v905_v48, %v913_v49  ;;  %v764_v48 = vld [vmem:[%s4176_s13 + $0x1b8] sm:$0xff] }
 0x31b   : > { %2553 = vmatpush1.bf16.msra.mxu1 %v3114_v55  ;;  %2511 = vmatprep.subr.bf16.mxu0 %v3129_v56  ;;  %v3243_v55 = vcombine.high %v906_v50, %v914_v35  ;;  %v921_v56 = vld [vmem:[%s4176_s13 + $0x6a0] sm:$0xff]  ;;  %v772_v49 = vld [vmem:[%s4176_s13 + $0x1f8] sm:$0xff]  ;;  %v3086_v35 = vcombine.low %v748_v40, %v756_v41 }
 0x31c   : > { %2554 = vmatprep.subr.bf16.mxu1 %v3131_v57  ;;  %v929_v57 = vld [vmem:[%s4176_s13 + $0x6e0] sm:$0xff] }
 0x31d   : > { %v3256_v5 = vcombine.low %v921_v56, %v929_v57 }
 0x31e   : > { %2512 = vmatpush1.bf16.msra.mxu0 %v3128_v62  ;;  %v3257_v62 = vcombine.high %v921_v56, %v929_v57  ;;  %v788_v56 = vld [vmem:[%s4176_s13 + $0x278] sm:$0xff] }
 0x31f   : > { %2555 = vmatpush1.bf16.msra.mxu1 %v3130_v63  ;;  %2513 = vmatprep.subr.bf16.mxu0 %v3145_v0  ;;  %v3259_v63 = vcombine.high %v922_v58, %v930_v59  ;;  %v937_v0 = vld [vmem:[%s4176_s13 + $0x720] sm:$0xff]  ;;  %v3102_v58 = vcombine.low %v764_v48, %v772_v49 }
 0x320   : > { %2556 = vmatprep.subr.bf16.mxu1 %v3147_v1  ;;  %v945_v1 = vld [vmem:[%s4176_s13 + $0x760] sm:$0xff] }
 0x321   : > { %v3272_v14 = vcombine.low %v937_v0, %v945_v1 }
 0x322   : > { %2514 = vmatpush1.bf16.msra.mxu0 %v3144_v8  ;;  %v3273_v8 = vcombine.high %v937_v0, %v945_v1  ;;  %v804_v0 = vld [vmem:[%s4176_s13 + $0x2f8] sm:$0xff] }
 0x323   : > { %2557 = vmatpush1.bf16.msra.mxu1 %v3146_v9  ;;  %2515 = vmatprep.subr.bf16.mxu0 %v3161_v10  ;;  %v3275_v9 = vcombine.high %v938_v2, %v946_v4  ;;  %v953_v10 = vld [vmem:[%s4176_s13 + $0x7a0] sm:$0xff] }
 0x324   : > { %2558 = vmatprep.subr.bf16.mxu1 %v3163_v11  ;;  %v961_v11 = vld [vmem:[%s4176_s13 + $0x7e0] sm:$0xff] }
 0x325   : > { %v3288_v22 = vcombine.low %v953_v10, %v961_v11 }
 0x326   : > { %2516 = vmatpush1.bf16.msra.mxu0 %v3160_v16  ;;  %v3289_v16 = vcombine.high %v953_v10, %v961_v11  ;;  %v820_v10 = vld [vmem:[%s4176_s13 + $0x378] sm:$0xff] }
 0x327   : > { %2559 = vmatpush1.bf16.msra.mxu1 %v3162_v17  ;;  %2517 = vmatprep.subr.bf16.mxu0 %v3177_v18  ;;  %v3291_v17 = vcombine.high %v954_v12, %v962_v13  ;;  %v715_v18 = vld [vmem:[%s4176_s13 + $0x30] sm:$0xff] }
 0x328   : > { %2560 = vmatprep.subr.bf16.mxu1 %v3179_v19  ;;  %v723_v19 = vld [vmem:[%s4176_s13 + $0x70] sm:$0xff] }
 0x329   : > { %v3052_v30 = vcombine.low %v715_v18, %v723_v19 }
 0x32a   : > { %2518 = vmatpush1.bf16.msra.mxu0 %v3176_v24  ;;  %v3053_v24 = vcombine.high %v715_v18, %v723_v19  ;;  %v836_v18 = vld [vmem:[%s4176_s13 + $0x3f8] sm:$0xff] }
 0x32b   : > { %2561 = vmatpush1.bf16.msra.mxu1 %v3178_v25  ;;  %2519 = vmatprep.subr.bf16.mxu0 %v3193_v27  ;;  %v3055_v25 = vcombine.high %v716_v20, %v724_v21  ;;  %v731_v27 = vld [vmem:[%s4176_s13 + $0xb0] sm:$0xff] }
 0x32c   : > { %2562 = vmatprep.subr.bf16.mxu1 %v3195_v28  ;;  %v739_v28 = vld [vmem:[%s4176_s13 + $0xf0] sm:$0xff] }
 0x32d   : > { %v3068_v42 = vcombine.low %v731_v27, %v739_v28 }
 0x32e   : > { %2520 = vmatpush1.bf16.msra.mxu0 %v3192_v36  ;;  %v3069_v36 = vcombine.high %v731_v27, %v739_v28  ;;  %v852_v27 = vld [vmem:[%s4176_s13 + $0x478] sm:$0xff] }
 0x32f   : > { %2563 = vmatpush1.bf16.msra.mxu1 %v3194_v37  ;;  %2521 = vmatprep.subr.bf16.mxu0 %v3209_v38  ;;  %v747_v37 = vld [vmem:[%s4176_s13 + $0x130] sm:$0xff] }
 0x330   : > { %2564 = vmatprep.subr.bf16.mxu1 %v3211_v39  ;;  %v755_v38 = vld [vmem:[%s4176_s13 + $0x170] sm:$0xff]  ;;  %v3071_v39 = vcombine.high %v732_v31, %v740_v33 }
 0x331   : > { %v3084_v50 = vcombine.low %v747_v37, %v755_v38 }
 0x332   : > { %2522 = vmatpush1.bf16.msra.mxu0 %v3208_v44  ;;  %v3085_v44 = vcombine.high %v747_v37, %v755_v38  ;;  %v860_v37 = vld [vmem:[%s4176_s13 + $0x4b8] sm:$0xff] }
 0x333   : > { %2565 = vmatpush1.bf16.msra.mxu1 %v3210_v45  ;;  %2523 = vmatprep.subr.bf16.mxu0 %v3225_v46  ;;  %v3087_v45 = vcombine.high %v748_v40, %v756_v41  ;;  %v763_v46 = vld [vmem:[%s4176_s13 + $0x1b0] sm:$0xff]  ;;  %v868_v38 = vld [vmem:[%s4176_s13 + $0x4f8] sm:$0xff] }
 0x334   : > { %2566 = vmatprep.subr.bf16.mxu1 %v3227_v47  ;;  %v771_v47 = vld [vmem:[%s4176_s13 + $0x1f0] sm:$0xff] }
 0x335   : > { %v3100_v57 = vcombine.low %v763_v46, %v771_v47 }
 0x336   : > { %2524 = vmatpush1.bf16.msra.mxu0 %v3224_v52  ;;  %v3101_v52 = vcombine.high %v763_v46, %v771_v47  ;;  %v884_v46 = vld [vmem:[%s4176_s13 + $0x578] sm:$0xff] }
 0x337   : > { %2567 = vmatpush1.bf16.msra.mxu1 %v3226_v53  ;;  %2525 = vmatprep.subr.bf16.mxu0 %v3241_v54  ;;  %v779_v53 = vld [vmem:[%s4176_s13 + $0x230] sm:$0xff] }
 0x338   : > { %2568 = vmatprep.subr.bf16.mxu1 %v3243_v55  ;;  %v787_v54 = vld [vmem:[%s4176_s13 + $0x270] sm:$0xff]  ;;  %v780_v55 = vld [vmem:[%s4176_s13 + $0x238] sm:$0xff] }
 0x339   : > { %v3117_v59 = vcombine.high %v779_v53, %v787_v54  ;;  %v3116_v1 = vcombine.low %v779_v53, %v787_v54  ;;  %v3118_v2 = vcombine.low %v780_v55, %v788_v56  ;;  %v900_v53 = vld [vmem:[%s4176_s13 + $0x5f8] sm:$0xff] }
 0x33a   : > { %2526 = vmatpush1.bf16.msra.mxu0 %v3240_v60  ;;  %v3119_v60 = vcombine.high %v780_v55, %v788_v56 }
 0x33b   : > { %2569 = vmatpush1.bf16.msra.mxu1 %v3242_v61  ;;  %2527 = vmatprep.subr.bf16.mxu0 %v3257_v62  ;;  %v795_v61 = vld [vmem:[%s4176_s13 + $0x2b0] sm:$0xff] }
 0x33c   : > { %2570 = vmatprep.subr.bf16.mxu1 %v3259_v63  ;;  %v803_v62 = vld [vmem:[%s4176_s13 + $0x2f0] sm:$0xff]  ;;  %v796_v63 = vld [vmem:[%s4176_s13 + $0x2b8] sm:$0xff] }
 0x33d   : > { %v3133_v4 = vcombine.high %v795_v61, %v803_v62  ;;  %v3132_v11 = vcombine.low %v795_v61, %v803_v62  ;;  %v3134_v12 = vcombine.low %v796_v63, %v804_v0  ;;  %v916_v61 = vld [vmem:[%s4176_s13 + $0x678] sm:$0xff] }
 0x33e   : > { %2528 = vmatpush1.bf16.msra.mxu0 %v3256_v5  ;;  %v3135_v5 = vcombine.high %v796_v63, %v804_v0 }
 0x33f   : > { %2571 = vmatpush1.bf16.msra.mxu1 %v3258_v6  ;;  %2529 = vmatprep.subr.bf16.mxu0 %v3273_v8  ;;  %v811_v6 = vld [vmem:[%s4176_s13 + $0x330] sm:$0xff] }
 0x340   : > { %2572 = vmatprep.subr.bf16.mxu1 %v3275_v9  ;;  %v819_v8 = vld [vmem:[%s4176_s13 + $0x370] sm:$0xff]  ;;  %v812_v9 = vld [vmem:[%s4176_s13 + $0x338] sm:$0xff] }
 0x341   : > { %v3149_v13 = vcombine.high %v811_v6, %v819_v8  ;;  %v3148_v19 = vcombine.low %v811_v6, %v819_v8  ;;  %v3150_v20 = vcombine.low %v812_v9, %v820_v10  ;;  %v932_v6 = vld [vmem:[%s4176_s13 + $0x6f8] sm:$0xff] }
 0x342   : > { %2530 = vmatpush1.bf16.msra.mxu0 %v3272_v14  ;;  %v3151_v14 = vcombine.high %v812_v9, %v820_v10 }
 0x343   : > { %2573 = vmatpush1.bf16.msra.mxu1 %v3274_v15  ;;  %2531 = vmatprep.subr.bf16.mxu0 %v3289_v16  ;;  %v827_v15 = vld [vmem:[%s4176_s13 + $0x3b0] sm:$0xff] }
 0x344   : > { %2574 = vmatprep.subr.bf16.mxu1 %v3291_v17  ;;  %v835_v16 = vld [vmem:[%s4176_s13 + $0x3f0] sm:$0xff]  ;;  %v828_v17 = vld [vmem:[%s4176_s13 + $0x3b8] sm:$0xff] }
 0x345   : > { %v3165_v21 = vcombine.high %v827_v15, %v835_v16  ;;  %v3164_v28 = vcombine.low %v827_v15, %v835_v16  ;;  %v948_v15 = vld [vmem:[%s4176_s13 + $0x778] sm:$0xff] }
 0x346   : > { %2532 = vmatpush1.bf16.msra.mxu0 %v3288_v22  ;;  %v3167_v22 = vcombine.high %v828_v17, %v836_v18 }
 0x347   : > { %2575 = vmatpush1.bf16.msra.mxu1 %v3290_v23  ;;  %2587 = vmatprep.subr.bf16.mxu0 %v3053_v24  ;;  %v843_v23 = vld [vmem:[%s4176_s13 + $0x430] sm:$0xff] }
 0x348   : > { %2630 = vmatprep.subr.bf16.mxu1 %v3055_v25  ;;  %v851_v24 = vld [vmem:[%s4176_s13 + $0x470] sm:$0xff]  ;;  %v844_v25 = vld [vmem:[%s4176_s13 + $0x438] sm:$0xff] }
 0x349   : > { %2534 = vmatmul.mubr.bf16.vlgmr.msra.gmra.mrb[12].mxu0 %v4273_v3  ;;  %v3181_v31 = vcombine.high %v843_v23, %v851_v24  ;;  %v3183_v33 = vcombine.high %v844_v25, %v852_v27  ;;  %v3182_v40 = vcombine.low %v844_v25, %v852_v27 }
 0x34a   : > { %2577 = vmatmul.mubr.bf16.vlgmr.msra.gmra.mrb[12].mxu1 %v4273_v3  ;;  %2588 = vmatpush1.bf16.msra.mxu0 %v3052_v30  ;;  %v3166_v30 = vcombine.low %v828_v17, %v836_v18 }
 0x34b   : > { %2619 = vmatprep.mubr.bf16.mxu0 %v4278_v7  ;;  %2631 = vmatpush1.bf16.msra.mxu1 %v3054_v34  ;;  %v859_v34 = vld [vmem:[%s4176_s13 + $0x4b0] sm:$0xff] }
 0x34c   : > { %2662 = vmatprep.mubr.bf16.mxu1 %v4278_v7  ;;  %2589 = vmatprep.subr.bf16.mxu0 %v3069_v36  ;;  %v3103_v7 = vcombine.high %v764_v48, %v772_v49  ;;  %v867_v36 = vld [vmem:[%s4176_s13 + $0x4f0] sm:$0xff]  ;;  %v3198_v48 = vcombine.low %v860_v37, %v868_v38 }
 0x34d   : > { %2632 = vmatprep.subr.bf16.mxu1 %v3071_v39  ;;  %v3180_v39 = vcombine.low %v843_v23, %v851_v24  ;;  %v3197_v41 = vcombine.high %v859_v34, %v867_v36  ;;  %v3196_v47 = vcombine.low %v859_v34, %v867_v36  ;;  %v964_v23 = vld [vmem:[%s4176_s13 + $0x7f8] sm:$0xff]  ;;  %v965_v34 = vld [vmem:[%s4482_s9] sm:$0xff]  ;;  %v983_v36 = vsub.s32 3, %v4262_v29 }
 0x34e   : > { %2590 = vmatpush1.bf16.msra.mxu0 %v3068_v42  ;;  %v3199_v42 = vcombine.high %v860_v37, %v868_v38  ;;  %v972_v37 = vrot.slane %v965_v34, %v4265_v32 }
 0x34f   : > { %2633 = vmatpush1.bf16.msra.mxu1 %v3070_v43  ;;  %2591 = vmatprep.subr.bf16.mxu0 %v3085_v44  ;;  %v875_v43 = vld [vmem:[%s4176_s13 + $0x530] sm:$0xff] }
 0x350   : > { %2634 = vmatprep.subr.bf16.mxu1 %v3087_v45  ;;  %v883_v44 = vld [vmem:[%s4176_s13 + $0x570] sm:$0xff]  ;;  %v876_v45 = vld [vmem:[%s4176_s13 + $0x538] sm:$0xff] }
 0x351   : > { %v3213_v49 = vcombine.high %v875_v43, %v883_v44  ;;  %v3212_v54 = vcombine.low %v875_v43, %v883_v44  ;;  %v3214_v55 = vcombine.low %v876_v45, %v884_v46 }
 0x352   : > { %2592 = vmatpush1.bf16.msra.mxu0 %v3084_v50  ;;  %v3215_v50 = vcombine.high %v876_v45, %v884_v46 }
 0x353   : > { %2635 = vmatpush1.bf16.msra.mxu1 %v3086_v35  ;;  %2593 = vmatprep.subr.bf16.mxu0 %v3101_v52  ;;  %v891_v35 = vld [vmem:[%s4176_s13 + $0x5b0] sm:$0xff] }
 0x354   : > { %2636 = vmatprep.subr.bf16.mxu1 %v3103_v7  ;;  %v899_v52 = vld [vmem:[%s4176_s13 + $0x5f0] sm:$0xff]  ;;  %v892_v7 = vld [vmem:[%s4176_s13 + $0x5b8] sm:$0xff] }
 0x355   : > { %v3229_v56 = vcombine.high %v891_v35, %v899_v52  ;;  %v3228_v62 = vcombine.low %v891_v35, %v899_v52  ;;  %v3230_v63 = vcombine.low %v892_v7, %v900_v53 }
 0x356   : > { %2594 = vmatpush1.bf16.msra.mxu0 %v3100_v57  ;;  %v3231_v57 = vcombine.high %v892_v7, %v900_v53 }
 0x357   : > { %2637 = vmatpush1.bf16.msra.mxu1 %v3102_v58  ;;  %2595 = vmatprep.subr.bf16.mxu0 %v3117_v59  ;;  %v907_v58 = vld [vmem:[%s4176_s13 + $0x630] sm:$0xff] }
 0x358   : > { %2638 = vmatprep.subr.bf16.mxu1 %v3119_v60  ;;  %v915_v59 = vld [vmem:[%s4176_s13 + $0x670] sm:$0xff]  ;;  %v908_v60 = vld [vmem:[%s4176_s13 + $0x638] sm:$0xff] }
 0x359   : > { %v3245_v0 = vcombine.high %v907_v58, %v915_v59  ;;  %v3244_v8 = vcombine.low %v907_v58, %v915_v59  ;;  %v3246_v9 = vcombine.low %v908_v60, %v916_v61 }
 0x35a   : > { %2596 = vmatpush1.bf16.msra.mxu0 %v3116_v1  ;;  %v3247_v1 = vcombine.high %v908_v60, %v916_v61 }
 0x35b   : > { %2639 = vmatpush1.bf16.msra.mxu1 %v3118_v2  ;;  %2597 = vmatprep.subr.bf16.mxu0 %v3133_v4  ;;  %v923_v2 = vld [vmem:[%s4176_s13 + $0x6b0] sm:$0xff] }
 0x35c   : > { %2640 = vmatprep.subr.bf16.mxu1 %v3135_v5  ;;  %v931_v4 = vld [vmem:[%s4176_s13 + $0x6f0] sm:$0xff]  ;;  %v924_v5 = vld [vmem:[%s4176_s13 + $0x6b8] sm:$0xff] }
 0x35d   : > { %v3261_v10 = vcombine.high %v923_v2, %v931_v4  ;;  %v3260_v16 = vcombine.low %v923_v2, %v931_v4  ;;  %v3262_v17 = vcombine.low %v924_v5, %v932_v6 }
 0x35e   : > { %2598 = vmatpush1.bf16.msra.mxu0 %v3132_v11  ;;  %v3263_v11 = vcombine.high %v924_v5, %v932_v6 }
 0x35f   : > { %2641 = vmatpush1.bf16.msra.mxu1 %v3134_v12  ;;  %2599 = vmatprep.subr.bf16.mxu0 %v3149_v13  ;;  %v939_v12 = vld [vmem:[%s4176_s13 + $0x730] sm:$0xff] }
 0x360   : > { %2642 = vmatprep.subr.bf16.mxu1 %v3151_v14  ;;  %v947_v13 = vld [vmem:[%s4176_s13 + $0x770] sm:$0xff]  ;;  %v940_v14 = vld [vmem:[%s4176_s13 + $0x738] sm:$0xff] }
 0x361   : > { %v3277_v18 = vcombine.high %v939_v12, %v947_v13  ;;  %v3276_v24 = vcombine.low %v939_v12, %v947_v13  ;;  %v3278_v25 = vcombine.low %v940_v14, %v948_v15  ;;  %v999_v12 = vsub.s32 7, %v4262_v29 }
 0x362   : > { %2600 = vmatpush1.bf16.msra.mxu0 %v3148_v19  ;;  %v3279_v19 = vcombine.high %v940_v14, %v948_v15 }
 0x363   : > { %2643 = vmatpush1.bf16.msra.mxu1 %v3150_v20  ;;  %2601 = vmatprep.subr.bf16.mxu0 %v3165_v21  ;;  %v955_v20 = vld [vmem:[%s4176_s13 + $0x7b0] sm:$0xff] }
 0x364   : > { %2644 = vmatprep.subr.bf16.mxu1 %v3167_v22  ;;  %v963_v21 = vld [vmem:[%s4176_s13 + $0x7f0] sm:$0xff]  ;;  %v956_v22 = vld [vmem:[%s4176_s13 + $0x7b8] sm:$0xff] }
 0x365   : > { %v3293_v27 = vcombine.high %v955_v20, %v963_v21 }
 0x366   : > { %2602 = vmatpush1.bf16.msra.mxu0 %v3164_v28  ;;  %v3295_v28 = vcombine.high %v956_v22, %v964_v23 }
 0x367   : > { %2645 = vmatpush1.bf16.msra.mxu1 %v3166_v30  ;;  %2603 = vmatprep.subr.bf16.mxu0 %v3181_v31  ;;  %v3292_v30 = vcombine.low %v955_v20, %v963_v21  ;;  %v3294_v31 = vcombine.low %v956_v22, %v964_v23 }
 0x368   : > { %2646 = vmatprep.subr.bf16.mxu1 %v3183_v33  ;;  %v979_v33 = vsub.s32 2, %v4262_v29 }
 0x36a   : > { %2604 = vmatpush1.bf16.msra.mxu0 %v3180_v39  ;;  %v980_v38 = vrot.slane %v965_v34, %v979_v33 }
 0x36b   : > { %2647 = vmatpush1.bf16.msra.mxu1 %v3182_v40  ;;  %2605 = vmatprep.subr.bf16.mxu0 %v3197_v41  ;;  %v976_v41 = vrot.slane %v965_v34, %v4268_v51 }
 0x36c   : > { %2648 = vmatprep.subr.bf16.mxu1 %v3199_v42 }
 0x36e   : > { %2606 = vmatpush1.bf16.msra.mxu0 %v3196_v47 }
 0x36f   : > { %2649 = vmatpush1.bf16.msra.mxu1 %v3198_v48  ;;  %2607 = vmatprep.subr.bf16.mxu0 %v3213_v49 }
 0x370   : > { %2650 = vmatprep.subr.bf16.mxu1 %v3215_v50 }
 0x372   : > { %2608 = vmatpush1.bf16.msra.mxu0 %v3212_v54 }
 0x373   : > { %2651 = vmatpush1.bf16.msra.mxu1 %v3214_v55  ;;  %2609 = vmatprep.subr.bf16.mxu0 %v3229_v56 }
 0x374   : > { %2652 = vmatprep.subr.bf16.mxu1 %v3231_v57 }
 0x376   : > { %2610 = vmatpush1.bf16.msra.mxu0 %v3228_v62 }
 0x377   : > { %2653 = vmatpush1.bf16.msra.mxu1 %v3230_v63  ;;  %2611 = vmatprep.subr.bf16.mxu0 %v3245_v0 }
 0x378   : > { %2654 = vmatprep.subr.bf16.mxu1 %v3247_v1 }
 0x37a   : > { %2612 = vmatpush1.bf16.msra.mxu0 %v3244_v8 }
 0x37b   : > { %2655 = vmatpush1.bf16.msra.mxu1 %v3246_v9  ;;  %2613 = vmatprep.subr.bf16.mxu0 %v3261_v10  ;;  %v987_v9 = vsub.s32 4, %v4262_v29  ;;  %v995_v10 = vsub.s32 6, %v4262_v29 }
 0x37c   : > { %2656 = vmatprep.subr.bf16.mxu1 %v3263_v11  ;;  %v991_v11 = vsub.s32 5, %v4262_v29 }
 0x37d   : > { %v988_v13 = vrot.slane %v965_v34, %v987_v9  ;;  %v996_v14 = vrot.slane %v965_v34, %v995_v10 }
 0x37e   : > { %2614 = vmatpush1.bf16.msra.mxu0 %v3260_v16 }
 0x37f   : > { %2657 = vmatpush1.bf16.msra.mxu1 %v3262_v17  ;;  %2615 = vmatprep.subr.bf16.mxu0 %v3277_v18  ;;  %v992_v17 = vrot.slane %v965_v34, %v991_v11  ;;  %v1000_v18 = vrot.slane %v965_v34, %v999_v12 }
 0x380   : > { %2658 = vmatprep.subr.bf16.mxu1 %v3279_v19 }
 0x382   : > { %2616 = vmatpush1.bf16.msra.mxu0 %v3276_v24 }
 0x383   : > { %2659 = vmatpush1.bf16.msra.mxu1 %v3278_v25  ;;  %2617 = vmatprep.subr.bf16.mxu0 %v3293_v27 }
 0x384   : > { %2660 = vmatprep.subr.bf16.mxu1 %v3295_v28 }
 0x386   : > { %2618 = vmatpush1.bf16.msra.mxu0 %v3292_v30 }
 0x387   : > { %2661 = vmatpush1.bf16.msra.mxu1 %v3294_v31 }
 0x389   : > { %2620 = vmatmul.mubr.bf16.vlgmr.msra.gmra.mrb[16].mxu0 %v4273_v3 }
 0x38a   : > { %2663 = vmatmul.mubr.bf16.vlgmr.msra.gmra.mrb[16].mxu1 %v4273_v3  ;;  %v984_v3 = vrot.slane %v965_v34, %v983_v36 }
 0x39c   : > { %v2363_v39 = vpop.f32.mrb[4].mxu0  ;;  %v2406_v40 = vpop.f32.mrb[4].mxu1 }
 0x39d   : > { %v2365_v42 = vpop.f32.mrb[5].mxu0  ;;  %v2408_v43 = vpop.f32.mrb[5].mxu1  ;;  %v2364_v46 = vadd.f32 %v2363_v39, %v972_v37  ;;  %v2407_v47 = vadd.f32 %v2406_v40, %v980_v38 }
 0x39e   : > { %v2367_v44 = vpop.f32.mrb[6].mxu0  ;;  %v2410_v45 = vpop.f32.mrb[6].mxu1  ;;  %v2366_v52 = vadd.f32 %v2365_v42, %v976_v41  ;;  %v2409_v7 = vadd.f32 %v2408_v43, %v984_v3 }
 0x39f   : > { %v2368_v48 = vadd.f32 %v2367_v44, %v972_v37  ;;  %v2411_v49 = vadd.f32 %v2410_v45, %v980_v38  ;;  %v2369_v50 = vpop.f32.mrb[7].mxu0  ;;  %v2412_v35 = vpop.f32.mrb[7].mxu1 }
 0x3a0   : > { %v2370_v53 = vadd.f32 %v2369_v50, %v976_v41  ;;  %v2413_v54 = vadd.f32 %v2412_v35, %v984_v3 }
 0x3a1   : > { %v2673_v55 = vpack.c.bf16 %v2368_v48, %v2364_v46  ;;  %v2675_v56 = vpack.c.bf16 %v2411_v49, %v2407_v47 }
 0x3a2   : > { %v2674_v57 = vpack.c.bf16 %v2370_v53, %v2366_v52  ;;  %v2676_v58 = vpack.c.bf16 %v2413_v54, %v2409_v7  ;;  %v966_v53 = vld [vmem:[%s4482_s9 + $0x8] sm:$0xff] }
 0x3a3   : > { %3512 = vtanh.bf16 %v2673_v55  ;;  %v1004_v54 = vrot.slane %v966_v53, %v4265_v32 }
 0x3a4   : > { %3514 = vtanh.bf16 %v2675_v56  ;;  %v1012_v56 = vrot.slane %v966_v53, %v979_v33 }
 0x3a5   : > { %3516 = vtanh.bf16 %v2674_v57  ;;  %v1008_v57 = vrot.slane %v966_v53, %v4268_v51 }
 0x3a6   : > { %3518 = vtanh.bf16 %v2676_v58 }
 0x3ae   : > { %v3513_v59 = vpop.eup %3512 }
 0x3af   : > { %v3515_v60 = vpop.eup %3514  ;;  %v2705_v61 = vmax.bf16 %v3855_v26, %v3513_v59 }
 0x3b0   : > { %v3517_v62 = vpop.eup %3516  ;;  %v2707_v63 = vmax.bf16 %v3855_v26, %v3515_v60  ;;  %v1016_v60 = vrot.slane %v966_v53, %v983_v36 }
 0x3b1   : > { %v3519_v0 = vpop.eup %3518  ;;  %v2706_v1 = vmax.bf16 %v3855_v26, %v3517_v62 }
 0x3b2   : > { %v2708_v2 = vmax.bf16 %v3855_v26, %v3519_v0 }
 0x3b3   : > { %v3296_v4 = vcombine.low %v2705_v61, %v2706_v1  ;;  %v3304_v5 = vcombine.high %v2705_v61, %v2706_v1 }
 0x3b4   : > { %v3297_v6 = vcombine.low %v2707_v63, %v2708_v2  ;;  %v3305_v8 = vcombine.high %v2707_v63, %v2708_v2 }
 0x3b5   : > { %2801 = vst [vmem:[%s4497_s3] sm:$0xff] %v3296_v4  ;;  %2809 = vst [vmem:[%s4497_s3 + $0x40] sm:$0xff] %v3304_v5 }
 0x3b6   : > { %2802 = vst [vmem:[%s4497_s3 + $0x8] sm:$0xff] %v3297_v6  ;;  %2810 = vst [vmem:[%s4497_s3 + $0x48] sm:$0xff] %v3305_v8 }
 0x3dc   : > { %v2449_v15 = vpop.f32.mrb[8].mxu0  ;;  %v2492_v16 = vpop.f32.mrb[8].mxu1 }
 0x3dd   : > { %v2451_v19 = vpop.f32.mrb[9].mxu0  ;;  %v2494_v20 = vpop.f32.mrb[9].mxu1  ;;  %v2450_v23 = vadd.f32 %v2449_v15, %v988_v13  ;;  %v2493_v24 = vadd.f32 %v2492_v16, %v996_v14 }
 0x3de   : > { %v2453_v21 = vpop.f32.mrb[10].mxu0  ;;  %v2496_v22 = vpop.f32.mrb[10].mxu1  ;;  %v2452_v31 = vadd.f32 %v2451_v19, %v992_v17  ;;  %v2495_v37 = vadd.f32 %v2494_v20, %v1000_v18 }
 0x3df   : > { %v2454_v25 = vadd.f32 %v2453_v21, %v988_v13  ;;  %v2497_v27 = vadd.f32 %v2496_v22, %v996_v14  ;;  %v2455_v28 = vpop.f32.mrb[11].mxu0  ;;  %v2498_v30 = vpop.f32.mrb[11].mxu1 }
 0x3e0   : > { %v2456_v38 = vadd.f32 %v2455_v28, %v992_v17  ;;  %v2499_v39 = vadd.f32 %v2498_v30, %v1000_v18  ;;  %v1020_v30 = vrot.slane %v966_v53, %v987_v9 }
 0x3e1   : > { %v2677_v40 = vpack.c.bf16 %v2454_v25, %v2450_v23  ;;  %v2679_v41 = vpack.c.bf16 %v2497_v27, %v2493_v24 }
 0x3e2   : > { %v2678_v3 = vpack.c.bf16 %v2456_v38, %v2452_v31  ;;  %v2680_v42 = vpack.c.bf16 %v2499_v39, %v2495_v37  ;;  %v1028_v37 = vrot.slane %v966_v53, %v995_v10  ;;  %v1024_v38 = vrot.slane %v966_v53, %v991_v11 }
 0x3e3   : > { %3520 = vtanh.bf16 %v2677_v40 }
 0x3e4   : > { %3522 = vtanh.bf16 %v2679_v41  ;;  %v1032_v41 = vrot.slane %v966_v53, %v999_v12 }
 0x3e5   : > { %3524 = vtanh.bf16 %v2678_v3 }
 0x3e6   : > { %3526 = vtanh.bf16 %v2680_v42 }
 0x3ee   : > { %v3521_v34 = vpop.eup %3520 }
 0x3ef   : > { %v3523_v43 = vpop.eup %3522  ;;  %v2709_v44 = vmax.bf16 %v3855_v26, %v3521_v34 }
 0x3f0   : > { %v3525_v45 = vpop.eup %3524  ;;  %v2711_v46 = vmax.bf16 %v3855_v26, %v3523_v43 }
 0x3f1   : > { %v3527_v47 = vpop.eup %3526  ;;  %v2710_v48 = vmax.bf16 %v3855_v26, %v3525_v45 }
 0x3f2   : > { %v2712_v49 = vmax.bf16 %v3855_v26, %v3527_v47 }
 0x3f3   : > { %v3298_v50 = vcombine.low %v2709_v44, %v2710_v48  ;;  %v3306_v35 = vcombine.high %v2709_v44, %v2710_v48 }
 0x3f4   : > { %v3299_v52 = vcombine.low %v2711_v46, %v2712_v49  ;;  %v3307_v7 = vcombine.high %v2711_v46, %v2712_v49 }
 0x3f5   : > { %2803 = vst [vmem:[%s4497_s3 + $0x10] sm:$0xff] %v3298_v50  ;;  %2811 = vst [vmem:[%s4497_s3 + $0x50] sm:$0xff] %v3306_v35 }
 0x3f6   : > { %2804 = vst [vmem:[%s4497_s3 + $0x18] sm:$0xff] %v3299_v52  ;;  %2812 = vst [vmem:[%s4497_s3 + $0x58] sm:$0xff] %v3307_v7 }
 0x41c   : > { %v2535_v55 = vpop.f32.mrb[12].mxu0 }
 0x41d   : > { %v2578_v58 = vpop.f32.mrb[12].mxu1  ;;  %v2537_v59 = vpop.f32.mrb[13].mxu0  ;;  %v2536_v63 = vadd.f32 %v2535_v55, %v1004_v54 }
 0x41e   : > { %v2580_v61 = vpop.f32.mrb[13].mxu1  ;;  %v2539_v62 = vpop.f32.mrb[14].mxu0  ;;  %v2579_v4 = vadd.f32 %v2578_v58, %v1012_v56  ;;  %v2538_v5 = vadd.f32 %v2537_v59, %v1008_v57 }
 0x41f   : > { %v2540_v0 = vadd.f32 %v2539_v62, %v1004_v54  ;;  %v2582_v1 = vpop.f32.mrb[14].mxu1  ;;  %v2541_v2 = vpop.f32.mrb[15].mxu0  ;;  %v2581_v13 = vadd.f32 %v2580_v61, %v1016_v60 }
 0x420   : > { %v2583_v32 = vadd.f32 %v2582_v1, %v1012_v56  ;;  %v2542_v6 = vadd.f32 %v2541_v2, %v1008_v57  ;;  %v2584_v8 = vpop.f32.mrb[15].mxu1 }
 0x421   : > { %v2681_v33 = vpack.c.bf16 %v2540_v0, %v2536_v63  ;;  %v2585_v14 = vadd.f32 %v2584_v8, %v1016_v60 }
 0x422   : > { %v2683_v51 = vpack.c.bf16 %v2583_v32, %v2579_v4  ;;  %v2682_v15 = vpack.c.bf16 %v2542_v6, %v2538_v5 }
 0x423   : > { %3528 = vtanh.bf16 %v2681_v33  ;;  %v2684_v16 = vpack.c.bf16 %v2585_v14, %v2581_v13 }
 0x424   : > { %3530 = vtanh.bf16 %v2683_v51 }
 0x425   : > { %3532 = vtanh.bf16 %v2682_v15 }
 0x426   : > { %3534 = vtanh.bf16 %v2684_v16 }
 0x42e   : > { %v3529_v36 = vpop.eup %3528 }
 0x42f   : > { %v3531_v17 = vpop.eup %3530  ;;  %v2713_v18 = vmax.bf16 %v3855_v26, %v3529_v36 }
 0x430   : > { %v3533_v19 = vpop.eup %3532  ;;  %v2715_v20 = vmax.bf16 %v3855_v26, %v3531_v17 }
 0x431   : > { %v3535_v21 = vpop.eup %3534  ;;  %v2714_v22 = vmax.bf16 %v3855_v26, %v3533_v19 }
 0x432   : > { %v2716_v23 = vmax.bf16 %v3855_v26, %v3535_v21 }
 0x433   : > { %v3300_v24 = vcombine.low %v2713_v18, %v2714_v22  ;;  %v3308_v25 = vcombine.high %v2713_v18, %v2714_v22 }
 0x434   : > { %v3301_v27 = vcombine.low %v2715_v20, %v2716_v23  ;;  %v3309_v28 = vcombine.high %v2715_v20, %v2716_v23 }
 0x435   : > { %2805 = vst [vmem:[%s4497_s3 + $0x20] sm:$0xff] %v3300_v24  ;;  %2813 = vst [vmem:[%s4497_s3 + $0x60] sm:$0xff] %v3308_v25 }
 0x436   : > { %2806 = vst [vmem:[%s4497_s3 + $0x28] sm:$0xff] %v3301_v27  ;;  %2814 = vst [vmem:[%s4497_s3 + $0x68] sm:$0xff] %v3309_v28 }
 0x45c   : > { %v2621_v31 = vpop.f32.mrb[16].mxu0 }
 0x45d   : > { %v2664_v39 = vpop.f32.mrb[16].mxu1  ;;  %v2623_v40 = vpop.f32.mrb[17].mxu0  ;;  %v2622_v34 = vadd.f32 %v2621_v31, %v1020_v30 }
 0x45e   : > { %v2666_v3 = vpop.f32.mrb[17].mxu1  ;;  %v2625_v42 = vpop.f32.mrb[18].mxu0  ;;  %v2665_v46 = vadd.f32 %v2664_v39, %v1028_v37  ;;  %v2624_v9 = vadd.f32 %v2623_v40, %v1024_v38 }
 0x45f   : > { %v2626_v43 = vadd.f32 %v2625_v42, %v1020_v30  ;;  %v2668_v44 = vpop.f32.mrb[18].mxu1  ;;  %v2627_v45 = vpop.f32.mrb[19].mxu0  ;;  %v2667_v49 = vadd.f32 %v2666_v3, %v1032_v41 }
 0x460   : > { %v2669_v47 = vadd.f32 %v2668_v44, %v1028_v37  ;;  %v2628_v48 = vadd.f32 %v2627_v45, %v1024_v38  ;;  %v2670_v10 = vpop.f32.mrb[19].mxu1 }
 0x461   : > { %v2685_v11 = vpack.c.bf16 %v2626_v43, %v2622_v34  ;;  %v2671_v50 = vadd.f32 %v2670_v10, %v1032_v41 }
 0x462   : > { %v2687_v35 = vpack.c.bf16 %v2669_v47, %v2665_v46  ;;  %v2686_v52 = vpack.c.bf16 %v2628_v48, %v2624_v9 }
 0x463   : > { %3536 = vtanh.bf16 %v2685_v11  ;;  %v2688_v29 = vpack.c.bf16 %v2671_v50, %v2667_v49 }
 0x464   : > { %3538 = vtanh.bf16 %v2687_v35 }
 0x465   : > { %3540 = vtanh.bf16 %v2686_v52 }
 0x466   : > { %3542 = vtanh.bf16 %v2688_v29 }
 0x46e   : > { %v3537_v12 = vpop.eup %3536 }
 0x46f   : > { %v3539_v7 = vpop.eup %3538  ;;  %v2717_v53 = vmax.bf16 %v3855_v26, %v3537_v12 }
 0x470   : > { %v3541_v54 = vpop.eup %3540  ;;  %v2719_v55 = vmax.bf16 %v3855_v26, %v3539_v7 }
 0x471   : > { %v3543_v56 = vpop.eup %3542  ;;  %v2718_v57 = vmax.bf16 %v3855_v26, %v3541_v54 }
 0x472   : > { %v2720_v58 = vmax.bf16 %v3855_v26, %v3543_v56 }
 0x473   : > { %v3302_v59 = vcombine.low %v2717_v53, %v2718_v57  ;;  %v3310_v60 = vcombine.high %v2717_v53, %v2718_v57 }
 0x474   : > { %v3303_v61 = vcombine.low %v2719_v55, %v2720_v58  ;;  %v3311_v62 = vcombine.high %v2719_v55, %v2720_v58 }
 0x475   : > { %2807 = vst [vmem:[%s4497_s3 + $0x30] sm:$0xff] %v3302_v59  ;;  %2815 = vst [vmem:[%s4497_s3 + $0x70] sm:$0xff] %v3310_v60 }
 0x476   : > { %2808 = vst [vmem:[%s4497_s3 + $0x38] sm:$0xff] %v3303_v61  ;;  %2816 = vst [vmem:[%s4497_s3 + $0x78] sm:$0xff] %v3311_v62 }
 0x477   : > { %3757 = shalt.err (!%p3754_p9)
}
 0x478   : > { %s3758_s24 = scalar_lea.hbm %s4555_s1, 2048  ;;  %s3762_s11 = scalar_lea.hbm %s4676_s14, 4096 }
 0x479   : > { %p3759_p0 = scmp.ne.s32.totalorder %s4555_s1, %s3758_s24  ;;  %p3763_p2 = scmp.lt.u32.totalorder %s4555_s1, %s4676_s14 }
 0x47a   : > { %p3764_p3 = scmp.lt.u32.totalorder %s3762_s11, %s3758_s24  ;;  %p3766_p6 = scmp.lt.u32.totalorder %s3758_s24, %s4555_s1 }
 0x47b   : > { %p3760_p5 = pnand %p3759_p0, %p4677_p13 }
 0x47c   : > { %p3765_p4 = por %p3764_p3, %p3763_p2 }
 0x47d   : > { %p3761_p10 = pneg %p3760_p5 }
 0x47e   : > { %p3767_p12 = por %p3766_p6, %p3765_p4 }
 0x480   : > { %p3768_p7 = pnand %p3767_p12, %p3761_p10 }
 0x482   : > { %3771 = shalt.err (!%p3768_p7)
}
 0x483   : > { %s3857_s13 = smov 1024   ;;  %s3858_s30 = smov 2048  }
 0x484   : > { %s3859_s9 = smov 64  }
 0x485   : > { %3373 = dma.vmem_to_hbm [thread:$0]  (%p4677_p13), %s4557_s7, 2048, %s4555_s1, %s2818_s27, %s3857_s13, %s3858_s30, %s3859_s9  }
 0x486 PF: > { %s4678_s19 = sld [smem:[#allocation20_spill]]  ;;  %s4679_s3 = sld [smem:[#allocation22_spill]] }
 0x487   : > { %s4680_s17 = sld [smem:[#allocation21_spill]] }
 0x48c   : > { %s2849_s18 = sand.u32 1, %s4678_s19   ;;  %p4681_p8 = scmp.ne.s32.totalorder %s4679_s3, 0 }
 0x48d   : > { %p4682_p11 = scmp.ge.s32.totalorder %s4680_s17, 2  ;;  %s2850_s21 = scalar_lea.sflag [#allocation4], %s2849_s18 }
 0x48f   : > { %p3399_p1 = pnand %p4682_p11, %p4681_p8 }
 0x491   : > { %3813 = dma.done.wait (!%p3399_p1), %s2850_s21, 2048  }
 0x492   : > { %3815 = vsyncadd (!%p3399_p1), %s2850_s21, 4294965248  ;;  %s26_s29 = sadd.s32 1, %s4680_s17   ;;  %s4683_s20 = sld [smem:[#allocation25_spill]] }
 0x493   : > { %p23_p9 = scmp.ge.s32.totalorder %s26_s29, 4   ;;  %s4684_s15 = sld [smem:[#allocation23_spill]] }
 0x494   : > { %s4685_s24 = smov %s3822_s25  ;;  %s4686_s25 = smov %s3826_s26 }
 0x495   : > { %s4688_s27 = smov %s3834_s28  ;;  %25 = sbr.rel (!%p23_p9) target bundleno = 14 (0xe), region = 126 }
 0x498   : > { %s4687_s26 = smov %s4683_s20 }
 0x499   : > { %s4689_s28 = smov %s4684_s15 }
 0x49c   :  { %2855 = vsyncpa [#allocation3], 1 }
 0x49d   :  { %2857 = vsyncpa [#allocation3 + $0x1], 1 }
 0x49e   :  { %2858 = vsyncpa [#allocation6], 1 }
 0x49f   :  { %2859 = vsyncpa [#allocation9], 1 }
 0x4a0   :  { %2860 = vsyncpa [#allocation12], 1 }
 0x4a1   :  { %2862 = vsyncpa [#allocation12 + $0x1], 1 }
 0x4a2   :  { %2863 = vsyncpa [#allocation4], 1 }
 0x4a3   :  { %2865 = vsyncpa [#allocation4 + $0x1], 1 }

</bundles_post_ra>
